<compile_context>
chip_gen: v7x
topology: tpu7x:2x2x1
jax: 0.10.0
libtpu: 0.0.40
codegen_flags: <defaults>
</compile_context>

<pallas_src>
import numpy as np
import jax
import jax.numpy as jnp
from jax.experimental import pallas as pl
from jax.experimental.pallas import tpu as pltpu


# ---------------------------------------------------------------------------
# Constant de-interleave (selection) matrices:  sel[c, 3*q + c, q] = 1
# so that  (row of 384 interleaved values) @ sel[c]  ==  channel-c plane (128)
# ---------------------------------------------------------------------------
def _make_selection_matrices():
    sel = np.zeros((3, 384, 128), dtype=np.float32)
    q = np.arange(128)
    for c in range(3):
        sel[c, 3 * q + c, q] = 1.0
    return sel


_SEL_NP = _make_selection_matrices()


def _ycbcr_to_rgb_kernel(x_ref, sel_ref, o_ref):
    """One grid step.

    x_ref : (tB, tG, 384) f32 -- tG rows of 128 pixels, channels interleaved
    sel_ref: (3, 384, 128) bf16 -- exact 0/1 de-interleave matrices
    o_ref : (tB, 3, tG, 128) f32 -- RGB channel planes (NCHW order)
    """
    tB = x_ref.shape[0]
    for i in range(tB):  # static unroll over batch items in this block
        x = x_ref[i]                                    # (tG, 384) f32
        # Exact-ish 3-way bf16 split of the f32 input (residual ~2^-24 * |x|).
        xh = x.astype(jnp.bfloat16)
        r1 = x - xh.astype(jnp.float32)
        xm = r1.astype(jnp.bfloat16)
        xl = (r1 - xm.astype(jnp.float32)).astype(jnp.bfloat16)

        def deinterleave(c):
            s = sel_ref[c]                              # (384, 128) bf16, {0,1}
            return (jnp.dot(xh, s, preferred_element_type=jnp.float32)
                    + jnp.dot(xm, s, preferred_element_type=jnp.float32)
                    + jnp.dot(xl, s, preferred_element_type=jnp.float32))

        y = deinterleave(0)
        cb = deinterleave(1) - 128.0
        cr = deinterleave(2) - 128.0
        # JPEG YCbCr -> RGB (f32 on the VPU; structural zeros exploited).
        o_ref[i, 0] = y + 1.402 * cr
        o_ref[i, 1] = y - 0.344136 * cb - 0.714136 * cr
        o_ref[i, 2] = y + 1.772 * cb


def _plan_blocks(B, G, row_cap=2048, max_tb=16):
    """Pick (tB, tG): batch items / 128-pixel rows per grid block.

    Invariants: tB * tG <= row_cap (block <= ~3 MiB per operand);
    tG is a multiple of 8 or equals G (legal (8,128) blocks).
    """
    # Rows per block along the G axis.
    min_steps = 2 if (B == 1 and G > 16) else 1   # give both v7x TCs work at B==1
    tG = min(row_cap, -(-G // min_steps))
    if tG < G:
        tG = max(8, (tG // 8) * 8)                # multiple of 8 when not full axis

    # Batch items per block (only useful when one row-block covers the image).
    tB = 1
    if tG == G and B > 1:
        cap_b = min(B, max_tb, max(1, row_cap // max(G, 1)))
        tB = cap_b
        for t in range(cap_b, max(cap_b // 2, 1) - 1, -1):  # prefer a divisor of B
            if B % t == 0:
                tB = t
                break

    # Keep at least 2 total grid steps when the work is non-trivial.
    num_b = -(-B // tB)
    num_g = -(-G // tG)
    if num_b * num_g < 2 and B * G > 16 and tB > 1:
        tB = max(1, (tB + 1) // 2)

    return tB, tG


def ycbcr_to_rgb_jpeg(image: jax.Array) -> jax.Array:
    """image: (B, H, W, 3) YCbCr float -> (B, 3, H, W) RGB float32."""
    B, H, W, C = image.shape
    assert C == 3
    image = image.astype(jnp.float32)

    P = H * W
    Pp = -(-P // 128) * 128                      # pad pixel count to whole 128-lane rows
    flat = image.reshape(B, P, 3)
    if Pp != P:
        flat = jnp.pad(flat, ((0, 0), (0, Pp - P), (0, 0)))
    G = Pp // 128                                # rows of 128 pixels
    x = flat.reshape(B, G, 384)                  # free, contiguous view of NHWC data

    tB, tG = _plan_blocks(B, G)
    num_b = -(-B // tB)
    num_g = -(-G // tG)

    sel = jnp.asarray(_SEL_NP, dtype=jnp.bfloat16)

    flops = 2 * 384 * 128 * 3 * 3 * B * G        # 9 (tG,384)x(384,128) bf16 matmuls/row
    bytes_accessed = B * G * (384 + 3 * 128) * 4 + sel.size * 2

    out = pl.pallas_call(
        _ycbcr_to_rgb_kernel,
        out_shape=jax.ShapeDtypeStruct((B, 3, G, 128), jnp.float32),
        grid=(num_b, num_g),
        in_specs=[
            pl.BlockSpec((tB, tG, 384), lambda b, g: (b, g, 0)),
            pl.BlockSpec((3, 384, 128), lambda b, g: (0, 0, 0)),  # resident constants
        ],
        out_specs=pl.BlockSpec((tB, 3, tG, 128), lambda b, g: (b, 0, g, 0)),
        compiler_params=pltpu.CompilerParams(
            dimension_semantics=("parallel", "parallel"),
            vmem_limit_bytes=48 * 1024 * 1024,
        ),
        cost_estimate=pl.CostEstimate(
            flops=flops, transcendentals=0, bytes_accessed=bytes_accessed),
    )(x, sel)

    out = out.reshape(B, 3, Pp)                  # free, contiguous
    if Pp != P:
        out = out[:, :, :P]
    return out.reshape(B, 3, H, W)


# ---------------------------------------------------------------------------
# Reference (numpy, float64) matching the PyTorch module.
# ---------------------------------------------------------------------------
def _reference_np(image_np):
    matrix = np.array(
        [[1.0, 0.0, 1.402],
         [1.0, -0.344136, -0.714136],
         [1.0, 1.772, 0.0]], dtype=np.float64).T
    shift = np.array([0.0, -128.0, -128.0], dtype=np.float64)
    res = np.tensordot(image_np.astype(np.float64) + shift, matrix, axes=1)
    return np.transpose(res, (0, 3, 1, 2))


if __name__ == "__main__":
    key = jax.random.PRNGKey(0)
    B, H, W = 2, 16, 16
    # YCbCr-ish values in [0, 255].
    image = jax.random.uniform(key, (B, H, W, 3), dtype=jnp.float32) * 255.0

    fn = jax.jit(ycbcr_to_rgb_jpeg)
    out = jax.block_until_ready(fn(image))
    np.testing.assert_allclose(np.asarray(out), _reference_np(np.asarray(image)),
                               rtol=1e-5, atol=1e-3)

    # Odd spatial size exercises the 128-pixel padding / partial-block path.
    image2 = jax.random.uniform(jax.random.PRNGKey(0), (1, 20, 19, 3),
                                dtype=jnp.float32) * 255.0
    out2 = jax.block_until_ready(jax.jit(ycbcr_to_rgb_jpeg)(image2))
    np.testing.assert_allclose(np.asarray(out2), _reference_np(np.asarray(image2)),
                               rtol=1e-5, atol=1e-3)

    print("KERNEL_OK")
</pallas_src>

<mosaic_0001>
module attributes {stable_mosaic.version = 11 : i64} {
  func.func @_ycbcr_to_rgb_kernel(%arg0: i32, %arg1: i32, %arg2: memref<2x2x384xf32, #tpu.memory_space<vmem>>, %arg3: memref<3x384x128xbf16, #tpu.memory_space<vmem>>, %arg4: memref<2x3x2x128xf32, #tpu.memory_space<vmem>>) attributes {dimension_semantics = [#tpu.dimension_semantics<parallel>, #tpu.dimension_semantics<parallel>], iteration_bounds = array<i64: 1, 1>, scalar_prefetch = 0 : i64, scratch_operands = 0 : i64, tpu.core_type = #tpu.core_type<tc>, window_params = [{transform_indices = @transform_0, window_bounds = array<i64: 2, 2, 384>}, {pipeline_mode = #tpu.pipeline_mode<synchronous>, transform_indices = @transform_1, window_bounds = array<i64: 3, 384, 128>}, {transform_indices = @transform_2, window_bounds = array<i64: 2, 3, 2, 128>}]} {
    %c0 = arith.constant 0 : index
    %c0_0 = arith.constant 0 : index
    %c0_1 = arith.constant 0 : index
    %0 = vector.load %arg2[%c0, %c0_0, %c0_1] : memref<2x2x384xf32, #tpu.memory_space<vmem>>, vector<1x2x384xf32>
    %1 = vector.shape_cast %0 : vector<1x2x384xf32> to vector<2x384xf32>
    %2 = arith.truncf %1 : vector<2x384xf32> to vector<2x384xbf16>
    %3 = arith.extf %2 : vector<2x384xbf16> to vector<2x384xf32>
    %4 = arith.subf %1, %3 : vector<2x384xf32>
    %5 = arith.truncf %4 : vector<2x384xf32> to vector<2x384xbf16>
    %6 = arith.extf %5 : vector<2x384xbf16> to vector<2x384xf32>
    %7 = arith.subf %4, %6 : vector<2x384xf32>
    %8 = arith.truncf %7 : vector<2x384xf32> to vector<2x384xbf16>
    %c0_2 = arith.constant 0 : index
    %c0_3 = arith.constant 0 : index
    %c0_4 = arith.constant 0 : index
    %9 = vector.load %arg3[%c0_2, %c0_3, %c0_4] : memref<3x384x128xbf16, #tpu.memory_space<vmem>>, vector<1x384x128xbf16>
    %10 = vector.shape_cast %9 : vector<1x384x128xbf16> to vector<384x128xbf16>
    %cst = arith.constant dense<0.000000e+00> : vector<2x128xf32>
    %11 = tpu.matmul %2, %10, %cst {dimension_numbers = #tpu.dot_dimension_numbers<[1], [0], [0], [1], [0, 0, 1, 1], [], []>} : vector<2x384xbf16>, vector<384x128xbf16>, vector<2x128xf32> -> vector<2x128xf32>
    %cst_5 = arith.constant dense<0.000000e+00> : vector<2x128xf32>
    %12 = tpu.matmul %5, %10, %cst_5 {dimension_numbers = #tpu.dot_dimension_numbers<[1], [0], [0], [1], [0, 0, 1, 1], [], []>} : vector<2x384xbf16>, vector<384x128xbf16>, vector<2x128xf32> -> vector<2x128xf32>
    %13 = arith.addf %11, %12 : vector<2x128xf32>
    %cst_6 = arith.constant dense<0.000000e+00> : vector<2x128xf32>
    %14 = tpu.matmul %8, %10, %cst_6 {dimension_numbers = #tpu.dot_dimension_numbers<[1], [0], [0], [1], [0, 0, 1, 1], [], []>} : vector<2x384xbf16>, vector<384x128xbf16>, vector<2x128xf32> -> vector<2x128xf32>
    %15 = arith.addf %13, %14 : vector<2x128xf32>
    %c1 = arith.constant 1 : index
    %c0_7 = arith.constant 0 : index
    %c0_8 = arith.constant 0 : index
    %16 = vector.load %arg3[%c1, %c0_7, %c0_8] : memref<3x384x128xbf16, #tpu.memory_space<vmem>>, vector<1x384x128xbf16>
    %17 = vector.shape_cast %16 : vector<1x384x128xbf16> to vector<384x128xbf16>
    %cst_9 = arith.constant dense<0.000000e+00> : vector<2x128xf32>
    %18 = tpu.matmul %2, %17, %cst_9 {dimension_numbers = #tpu.dot_dimension_numbers<[1], [0], [0], [1], [0, 0, 1, 1], [], []>} : vector<2x384xbf16>, vector<384x128xbf16>, vector<2x128xf32> -> vector<2x128xf32>
    %cst_10 = arith.constant dense<0.000000e+00> : vector<2x128xf32>
    %19 = tpu.matmul %5, %17, %cst_10 {dimension_numbers = #tpu.dot_dimension_numbers<[1], [0], [0], [1], [0, 0, 1, 1], [], []>} : vector<2x384xbf16>, vector<384x128xbf16>, vector<2x128xf32> -> vector<2x128xf32>
    %20 = arith.addf %18, %19 : vector<2x128xf32>
    %cst_11 = arith.constant dense<0.000000e+00> : vector<2x128xf32>
    %21 = tpu.matmul %8, %17, %cst_11 {dimension_numbers = #tpu.dot_dimension_numbers<[1], [0], [0], [1], [0, 0, 1, 1], [], []>} : vector<2x384xbf16>, vector<384x128xbf16>, vector<2x128xf32> -> vector<2x128xf32>
    %22 = arith.addf %20, %21 : vector<2x128xf32>
    %cst_12 = arith.constant 1.280000e+02 : f32
    %23 = vector.broadcast %cst_12 : f32 to vector<2x128xf32>
    %24 = arith.subf %22, %23 : vector<2x128xf32>
    %c2 = arith.constant 2 : index
    %c0_13 = arith.constant 0 : index
    %c0_14 = arith.constant 0 : index
    %25 = vector.load %arg3[%c2, %c0_13, %c0_14] : memref<3x384x128xbf16, #tpu.memory_space<vmem>>, vector<1x384x128xbf16>
    %26 = vector.shape_cast %25 : vector<1x384x128xbf16> to vector<384x128xbf16>
    %cst_15 = arith.constant dense<0.000000e+00> : vector<2x128xf32>
    %27 = tpu.matmul %2, %26, %cst_15 {dimension_numbers = #tpu.dot_dimension_numbers<[1], [0], [0], [1], [0, 0, 1, 1], [], []>} : vector<2x384xbf16>, vector<384x128xbf16>, vector<2x128xf32> -> vector<2x128xf32>
    %cst_16 = arith.constant dense<0.000000e+00> : vector<2x128xf32>
    %28 = tpu.matmul %5, %26, %cst_16 {dimension_numbers = #tpu.dot_dimension_numbers<[1], [0], [0], [1], [0, 0, 1, 1], [], []>} : vector<2x384xbf16>, vector<384x128xbf16>, vector<2x128xf32> -> vector<2x128xf32>
    %29 = arith.addf %27, %28 : vector<2x128xf32>
    %cst_17 = arith.constant dense<0.000000e+00> : vector<2x128xf32>
    %30 = tpu.matmul %8, %26, %cst_17 {dimension_numbers = #tpu.dot_dimension_numbers<[1], [0], [0], [1], [0, 0, 1, 1], [], []>} : vector<2x384xbf16>, vector<384x128xbf16>, vector<2x128xf32> -> vector<2x128xf32>
    %31 = arith.addf %29, %30 : vector<2x128xf32>
    %cst_18 = arith.constant 1.280000e+02 : f32
    %32 = vector.broadcast %cst_18 : f32 to vector<2x128xf32>
    %33 = arith.subf %31, %32 : vector<2x128xf32>
    %cst_19 = arith.constant 1.402000e+00 : f32
    %34 = vector.broadcast %cst_19 : f32 to vector<2x128xf32>
    %35 = arith.mulf %34, %33 : vector<2x128xf32>
    %36 = arith.addf %15, %35 : vector<2x128xf32>
    %c0_20 = arith.constant 0 : index
    %c0_21 = arith.constant 0 : index
    %c0_22 = arith.constant 0 : index
    %c0_23 = arith.constant 0 : index
    %37 = vector.load %arg4[%c0_20, %c0_21, %c0_22, %c0_23] : memref<2x3x2x128xf32, #tpu.memory_space<vmem>>, vector<1x1x2x128xf32>
    %38 = vector.shape_cast %37 : vector<1x1x2x128xf32> to vector<2x128xf32>
    %39 = vector.shape_cast %36 : vector<2x128xf32> to vector<1x1x2x128xf32>
    tpu.vector_store %arg4[%c0_20, %c0_21, %c0_22, %c0_23], %39 {strides = array<i32>} : memref<2x3x2x128xf32, #tpu.memory_space<vmem>>, vector<1x1x2x128xf32>,
    %cst_24 = arith.constant 3.441360e-01 : f32
    %40 = vector.broadcast %cst_24 : f32 to vector<2x128xf32>
    %41 = arith.mulf %40, %24 : vector<2x128xf32>
    %42 = arith.subf %15, %41 : vector<2x128xf32>
    %cst_25 = arith.constant 7.141360e-01 : f32
    %43 = vector.broadcast %cst_25 : f32 to vector<2x128xf32>
    %44 = arith.mulf %43, %33 : vector<2x128xf32>
    %45 = arith.subf %42, %44 : vector<2x128xf32>
    %c0_26 = arith.constant 0 : index
    %c1_27 = arith.constant 1 : index
    %c0_28 = arith.constant 0 : index
    %c0_29 = arith.constant 0 : index
    %46 = vector.load %arg4[%c0_26, %c1_27, %c0_28, %c0_29] : memref<2x3x2x128xf32, #tpu.memory_space<vmem>>, vector<1x1x2x128xf32>
    %47 = vector.shape_cast %46 : vector<1x1x2x128xf32> to vector<2x128xf32>
    %48 = vector.shape_cast %45 : vector<2x128xf32> to vector<1x1x2x128xf32>
    tpu.vector_store %arg4[%c0_26, %c1_27, %c0_28, %c0_29], %48 {strides = array<i32>} : memref<2x3x2x128xf32, #tpu.memory_space<vmem>>, vector<1x1x2x128xf32>,
    %cst_30 = arith.constant 1.772000e+00 : f32
    %49 = vector.broadcast %cst_30 : f32 to vector<2x128xf32>
    %50 = arith.mulf %49, %24 : vector<2x128xf32>
    %51 = arith.addf %15, %50 : vector<2x128xf32>
    %c0_31 = arith.constant 0 : index
    %c2_32 = arith.constant 2 : index
    %c0_33 = arith.constant 0 : index
    %c0_34 = arith.constant 0 : index
    %52 = vector.load %arg4[%c0_31, %c2_32, %c0_33, %c0_34] : memref<2x3x2x128xf32, #tpu.memory_space<vmem>>, vector<1x1x2x128xf32>
    %53 = vector.shape_cast %52 : vector<1x1x2x128xf32> to vector<2x128xf32>
    %54 = vector.shape_cast %51 : vector<2x128xf32> to vector<1x1x2x128xf32>
    tpu.vector_store %arg4[%c0_31, %c2_32, %c0_33, %c0_34], %54 {strides = array<i32>} : memref<2x3x2x128xf32, #tpu.memory_space<vmem>>, vector<1x1x2x128xf32>,
    %c1_35 = arith.constant 1 : index
    %c0_36 = arith.constant 0 : index
    %c0_37 = arith.constant 0 : index
    %55 = vector.load %arg2[%c1_35, %c0_36, %c0_37] : memref<2x2x384xf32, #tpu.memory_space<vmem>>, vector<1x2x384xf32>
    %56 = vector.shape_cast %55 : vector<1x2x384xf32> to vector<2x384xf32>
    %57 = arith.truncf %56 : vector<2x384xf32> to vector<2x384xbf16>
    %58 = arith.extf %57 : vector<2x384xbf16> to vector<2x384xf32>
    %59 = arith.subf %56, %58 : vector<2x384xf32>
    %60 = arith.truncf %59 : vector<2x384xf32> to vector<2x384xbf16>
    %61 = arith.extf %60 : vector<2x384xbf16> to vector<2x384xf32>
    %62 = arith.subf %59, %61 : vector<2x384xf32>
    %63 = arith.truncf %62 : vector<2x384xf32> to vector<2x384xbf16>
    %c0_38 = arith.constant 0 : index
    %c0_39 = arith.constant 0 : index
    %c0_40 = arith.constant 0 : index
    %64 = vector.load %arg3[%c0_38, %c0_39, %c0_40] : memref<3x384x128xbf16, #tpu.memory_space<vmem>>, vector<1x384x128xbf16>
    %65 = vector.shape_cast %64 : vector<1x384x128xbf16> to vector<384x128xbf16>
    %cst_41 = arith.constant dense<0.000000e+00> : vector<2x128xf32>
    %66 = tpu.matmul %57, %65, %cst_41 {dimension_numbers = #tpu.dot_dimension_numbers<[1], [0], [0], [1], [0, 0, 1, 1], [], []>} : vector<2x384xbf16>, vector<384x128xbf16>, vector<2x128xf32> -> vector<2x128xf32>
    %cst_42 = arith.constant dense<0.000000e+00> : vector<2x128xf32>
    %67 = tpu.matmul %60, %65, %cst_42 {dimension_numbers = #tpu.dot_dimension_numbers<[1], [0], [0], [1], [0, 0, 1, 1], [], []>} : vector<2x384xbf16>, vector<384x128xbf16>, vector<2x128xf32> -> vector<2x128xf32>
    %68 = arith.addf %66, %67 : vector<2x128xf32>
    %cst_43 = arith.constant dense<0.000000e+00> : vector<2x128xf32>
    %69 = tpu.matmul %63, %65, %cst_43 {dimension_numbers = #tpu.dot_dimension_numbers<[1], [0], [0], [1], [0, 0, 1, 1], [], []>} : vector<2x384xbf16>, vector<384x128xbf16>, vector<2x128xf32> -> vector<2x128xf32>
    %70 = arith.addf %68, %69 : vector<2x128xf32>
    %c1_44 = arith.constant 1 : index
    %c0_45 = arith.constant 0 : index
    %c0_46 = arith.constant 0 : index
    %71 = vector.load %arg3[%c1_44, %c0_45, %c0_46] : memref<3x384x128xbf16, #tpu.memory_space<vmem>>, vector<1x384x128xbf16>
    %72 = vector.shape_cast %71 : vector<1x384x128xbf16> to vector<384x128xbf16>
    %cst_47 = arith.constant dense<0.000000e+00> : vector<2x128xf32>
    %73 = tpu.matmul %57, %72, %cst_47 {dimension_numbers = #tpu.dot_dimension_numbers<[1], [0], [0], [1], [0, 0, 1, 1], [], []>} : vector<2x384xbf16>, vector<384x128xbf16>, vector<2x128xf32> -> vector<2x128xf32>
    %cst_48 = arith.constant dense<0.000000e+00> : vector<2x128xf32>
    %74 = tpu.matmul %60, %72, %cst_48 {dimension_numbers = #tpu.dot_dimension_numbers<[1], [0], [0], [1], [0, 0, 1, 1], [], []>} : vector<2x384xbf16>, vector<384x128xbf16>, vector<2x128xf32> -> vector<2x128xf32>
    %75 = arith.addf %73, %74 : vector<2x128xf32>
    %cst_49 = arith.constant dense<0.000000e+00> : vector<2x128xf32>
    %76 = tpu.matmul %63, %72, %cst_49 {dimension_numbers = #tpu.dot_dimension_numbers<[1], [0], [0], [1], [0, 0, 1, 1], [], []>} : vector<2x384xbf16>, vector<384x128xbf16>, vector<2x128xf32> -> vector<2x128xf32>
    %77 = arith.addf %75, %76 : vector<2x128xf32>
    %cst_50 = arith.constant 1.280000e+02 : f32
    %78 = vector.broadcast %cst_50 : f32 to vector<2x128xf32>
    %79 = arith.subf %77, %78 : vector<2x128xf32>
    %c2_51 = arith.constant 2 : index
    %c0_52 = arith.constant 0 : index
    %c0_53 = arith.constant 0 : index
    %80 = vector.load %arg3[%c2_51, %c0_52, %c0_53] : memref<3x384x128xbf16, #tpu.memory_space<vmem>>, vector<1x384x128xbf16>
    %81 = vector.shape_cast %80 : vector<1x384x128xbf16> to vector<384x128xbf16>
    %cst_54 = arith.constant dense<0.000000e+00> : vector<2x128xf32>
    %82 = tpu.matmul %57, %81, %cst_54 {dimension_numbers = #tpu.dot_dimension_numbers<[1], [0], [0], [1], [0, 0, 1, 1], [], []>} : vector<2x384xbf16>, vector<384x128xbf16>, vector<2x128xf32> -> vector<2x128xf32>
    %cst_55 = arith.constant dense<0.000000e+00> : vector<2x128xf32>
    %83 = tpu.matmul %60, %81, %cst_55 {dimension_numbers = #tpu.dot_dimension_numbers<[1], [0], [0], [1], [0, 0, 1, 1], [], []>} : vector<2x384xbf16>, vector<384x128xbf16>, vector<2x128xf32> -> vector<2x128xf32>
    %84 = arith.addf %82, %83 : vector<2x128xf32>
    %cst_56 = arith.constant dense<0.000000e+00> : vector<2x128xf32>
    %85 = tpu.matmul %63, %81, %cst_56 {dimension_numbers = #tpu.dot_dimension_numbers<[1], [0], [0], [1], [0, 0, 1, 1], [], []>} : vector<2x384xbf16>, vector<384x128xbf16>, vector<2x128xf32> -> vector<2x128xf32>
    %86 = arith.addf %84, %85 : vector<2x128xf32>
    %cst_57 = arith.constant 1.280000e+02 : f32
    %87 = vector.broadcast %cst_57 : f32 to vector<2x128xf32>
    %88 = arith.subf %86, %87 : vector<2x128xf32>
    %cst_58 = arith.constant 1.402000e+00 : f32
    %89 = vector.broadcast %cst_58 : f32 to vector<2x128xf32>
    %90 = arith.mulf %89, %88 : vector<2x128xf32>
    %91 = arith.addf %70, %90 : vector<2x128xf32>
    %c1_59 = arith.constant 1 : index
    %c0_60 = arith.constant 0 : index
    %c0_61 = arith.constant 0 : index
    %c0_62 = arith.constant 0 : index
    %92 = vector.load %arg4[%c1_59, %c0_60, %c0_61, %c0_62] : memref<2x3x2x128xf32, #tpu.memory_space<vmem>>, vector<1x1x2x128xf32>
    %93 = vector.shape_cast %92 : vector<1x1x2x128xf32> to vector<2x128xf32>
    %94 = vector.shape_cast %91 : vector<2x128xf32> to vector<1x1x2x128xf32>
    tpu.vector_store %arg4[%c1_59, %c0_60, %c0_61, %c0_62], %94 {strides = array<i32>} : memref<2x3x2x128xf32, #tpu.memory_space<vmem>>, vector<1x1x2x128xf32>,
    %cst_63 = arith.constant 3.441360e-01 : f32
    %95 = vector.broadcast %cst_63 : f32 to vector<2x128xf32>
    %96 = arith.mulf %95, %79 : vector<2x128xf32>
    %97 = arith.subf %70, %96 : vector<2x128xf32>
    %cst_64 = arith.constant 7.141360e-01 : f32
    %98 = vector.broadcast %cst_64 : f32 to vector<2x128xf32>
    %99 = arith.mulf %98, %88 : vector<2x128xf32>
    %100 = arith.subf %97, %99 : vector<2x128xf32>
    %c1_65 = arith.constant 1 : index
    %c1_66 = arith.constant 1 : index
    %c0_67 = arith.constant 0 : index
    %c0_68 = arith.constant 0 : index
    %101 = vector.load %arg4[%c1_65, %c1_66, %c0_67, %c0_68] : memref<2x3x2x128xf32, #tpu.memory_space<vmem>>, vector<1x1x2x128xf32>
    %102 = vector.shape_cast %101 : vector<1x1x2x128xf32> to vector<2x128xf32>
    %103 = vector.shape_cast %100 : vector<2x128xf32> to vector<1x1x2x128xf32>
    tpu.vector_store %arg4[%c1_65, %c1_66, %c0_67, %c0_68], %103 {strides = array<i32>} : memref<2x3x2x128xf32, #tpu.memory_space<vmem>>, vector<1x1x2x128xf32>,
    %cst_69 = arith.constant 1.772000e+00 : f32
    %104 = vector.broadcast %cst_69 : f32 to vector<2x128xf32>
    %105 = arith.mulf %104, %79 : vector<2x128xf32>
    %106 = arith.addf %70, %105 : vector<2x128xf32>
    %c1_70 = arith.constant 1 : index
    %c2_71 = arith.constant 2 : index
    %c0_72 = arith.constant 0 : index
    %c0_73 = arith.constant 0 : index
    %107 = vector.load %arg4[%c1_70, %c2_71, %c0_72, %c0_73] : memref<2x3x2x128xf32, #tpu.memory_space<vmem>>, vector<1x1x2x128xf32>
    %108 = vector.shape_cast %107 : vector<1x1x2x128xf32> to vector<2x128xf32>
    %109 = vector.shape_cast %106 : vector<2x128xf32> to vector<1x1x2x128xf32>
    tpu.vector_store %arg4[%c1_70, %c2_71, %c0_72, %c0_73], %109 {strides = array<i32>} : memref<2x3x2x128xf32, #tpu.memory_space<vmem>>, vector<1x1x2x128xf32>,
    return
  }
  func.func @transform_0(%arg0: i32, %arg1: i32) -> (i32, i32, i32) {
    %c0_i32 = arith.constant 0 : i32
    %c0_i32_0 = arith.constant 0 : i32
    return %arg0, %arg1, %c0_i32 : i32, i32, i32
  }
  func.func @transform_1(%arg0: i32, %arg1: i32) -> (i32, i32, i32) {
    %c0_i32 = arith.constant 0 : i32
    %c0_i32_0 = arith.constant 0 : i32
    %c0_i32_1 = arith.constant 0 : i32
    %c0_i32_2 = arith.constant 0 : i32
    return %c0_i32, %c0_i32_0, %c0_i32_1 : i32, i32, i32
  }
  func.func @transform_2(%arg0: i32, %arg1: i32) -> (i32, i32, i32, i32) {
    %c0_i32 = arith.constant 0 : i32
    %c0_i32_0 = arith.constant 0 : i32
    %c0_i32_1 = arith.constant 0 : i32
    return %arg0, %c0_i32, %arg1, %c0_i32_0 : i32, i32, i32, i32
  }
}

</mosaic_0001>

<bundles_post_ra>
// kernel: ycbcr_to_rgb_jpeg.1
= control target key start
LH: loop header
LB: loop body
LE: loop exit
PB: predicated region body
PF: predicated region fallthrough
CT: control target
= control target key end

     0   :  { %v4319_v0 = vmov 0.0   ;;  %vm4320_vm0 = vmmov 0   ;;  %v4321_v14 = vmov 1983009808   ;;  %v18_v16 = vlaneseq  ;;  %s5860_s1 = inlined_call_operand.vmem [shape: bf16[3,384,128], index: 1, kind: input, shape index: {}]   ;;  %s5861_s0 = inlined_call_operand.vmem [shape: f32[2,2,384], index: 0, kind: input, shape index: {}]   ;;  %s5862_s2 = inlined_call_operand.vmem [shape: f32[2,3,2,128], index: 2, kind: output, shape index: {}]  }
   0x1   :  { %3788 = vmatprep.subr.bf16.mxu1 %v4319_v0  ;;  %v4341_v1 = vld [vmem:[%s5860_s1 + $0x40] sm:$0xff]   ;;  %3804 = vmatprep.mubr.msk.bf16.mxu1 %vm4320_vm0, %v4319_v0  ;;  %v4360_v4 = vld [vmem:[%s5860_s1 + $0x48] sm:$0xff]   ;;  %v4378_v7 = vld [vmem:[%s5860_s1 + $0x50] sm:$0xff]   ;;  %v16_v15 = vunpack.c.l.s4 %v4321_v14 }
   0x2   :  { %v4348_v2 = vld [vmem:[%s5860_s1 + $0x80] sm:$0xff]   ;;  %3230 = vmatprep.subr.bf16.mxu0 %v4341_v1  ;;  %v4367_v5 = vld [vmem:[%s5860_s1 + $0x88] sm:$0xff]   ;;  %v4384_v8 = vld [vmem:[%s5860_s1 + $0x90] sm:$0xff]   ;;  %v19_v21 = vshrl.u32 %v18_v16, 7 }
   0x3   :  { %v4354_v3 = vld [vmem:[%s5860_s1] sm:$0xff]   ;;  %3789 = vmatpush3.bf16.msra.mxu1 %v4348_v2  ;;  %v4373_v6 = vld [vmem:[%s5860_s1 + $0x8] sm:$0xff]   ;;  %v4391_v9 = vld [vmem:[%s5860_s1 + $0x10] sm:$0xff]   ;;  %v17_v20 = vunpack.c.0.s8 %v16_v15 }
   0x4   :  { %3231 = vmatpush3.bf16.msra.mxu0 %v4354_v3  ;;  %3790 = vmatprep.subr.bf16.mxu1 %v4319_v0  ;;  %v4397_v10 = vld [vmem:[%s5860_s1 + $0x58] sm:$0xff]   ;;  %v4416_v13 = vld [vmem:[%s5860_s1 + $0x60] sm:$0xff]   ;;  %v4435_v19 = vld [vmem:[%s5860_s1 + $0x68] sm:$0xff]  }
   0x5   :  { %3232 = vmatprep.subr.bf16.mxu0 %v4360_v4  ;;  %v4403_v11 = vld [vmem:[%s5860_s1 + $0x98] sm:$0xff]   ;;  %v4422_v17 = vld [vmem:[%s5860_s1 + $0xa0] sm:$0xff]   ;;  %v4441_v22 = vld [vmem:[%s5860_s1 + $0xa8] sm:$0xff]   ;;  %v4456_v25 = vsub.s32 %v17_v20, %v19_v21 }
   0x6   :  { %v4410_v12 = vld [vmem:[%s5860_s1 + $0x18] sm:$0xff]   ;;  %v4429_v18 = vld [vmem:[%s5860_s1 + $0x20] sm:$0xff]   ;;  %v4448_v23 = vld [vmem:[%s5860_s1 + $0x28] sm:$0xff]  }
   0x7   :  { %3791 = vmatpush3.bf16.msra.mxu1 %v4367_v5  ;;  %v4454_v24 = vld [vmem:[%s5860_s1 + $0x70] sm:$0xff]   ;;  %v12_v28 = vld [vmem:[%s5861_s0] sm:$0x3f]  ;;  %v4478_v29 = vld [vmem:[%s5860_s1 + $0x78] sm:$0xff]  }
   0x8   :  { %3233 = vmatpush3.bf16.msra.mxu0 %v4373_v6  ;;  %3792 = vmatprep.subr.bf16.mxu1 %v4319_v0  ;;  %v4461_v26 = vld [vmem:[%s5860_s1 + $0xb0] sm:$0xff]   ;;  %v14_v30 = vcombine.high %v12_v28, %v12_v28  ;;  %v21_v31 = vrot.slane %v12_v28, %v4456_v25  ;;  %v4485_v32 = vld [vmem:[%s5860_s1 + $0xb8] sm:$0xff]   ;;  %v4700_v20 = vld [vmem:[%s5860_s1 + $0xe0] sm:$0xff]  }
   0x9   :  { %3234 = vmatprep.subr.bf16.mxu0 %v4378_v7  ;;  %v4467_v27 = vld [vmem:[%s5860_s1 + $0x30] sm:$0xff]   ;;  %v4495_v36 = vld [vmem:[%s5860_s1 + $0x38] sm:$0xff]   ;;  %v4706_v21 = vld [vmem:[%s5860_s1 + $0x128] sm:$0xff]  }
   0xa   :  { %v28_v33 = vrot.slane %v14_v30, %v4456_v25  ;;  %v29_v34 = vcombine.high %v21_v31, %v21_v31  ;;  %v4488_v35 = vpack.c.bf16 %v21_v31, %v21_v31  ;;  %v4665_v15 = vld [vmem:[%s5860_s1 + $0x118] sm:$0xff]   ;;  %v4837_v31 = vld [vmem:[%s5860_s1 + $0x1c0] sm:$0xff]  }
   0xb   :  { %3793 = vmatpush3.bf16.msra.mxu1 %v4384_v8  ;;  %v4674_v16 = vld [vmem:[%s5860_s1 + $0x158] sm:$0xff]  }
   0xc   :  { %3235 = vmatpush3.bf16.msra.mxu0 %v4391_v9  ;;  %3794 = vmatprep.subr.bf16.mxu1 %v4319_v0  ;;  %v4498_v37 = vpack.c.bf16 %v29_v34, %v29_v34  ;;  %v4500_v38 = vpack.c.bf16 %v28_v33, %v28_v33  ;;  %v36_v39 = vunpack.c.l.bf16 %v4488_v35  ;;  %v4757_v30 = vld [vmem:[%s5860_s1 + $0xf8] sm:$0xff]   ;;  %v4850_v33 = vld [vmem:[%s5860_s1 + $0x180] sm:$0xff]   ;;  %v4856_v34 = vld [vmem:[%s5860_s1 + $0x1c8] sm:$0xff]  }
   0xd   :  { %3236 = vmatprep.subr.bf16.mxu0 %v4397_v10 }
   0xe   :  { %v37_v40 = vunpack.c.l.bf16 %v4498_v37  ;;  %v38_v41 = vunpack.c.l.bf16 %v4500_v38 }
   0xf   :  { %3795 = vmatpush3.bf16.msra.mxu1 %v4403_v11 }
  0x10   :  { %3237 = vmatpush3.bf16.msra.mxu0 %v4410_v12  ;;  %3796 = vmatprep.subr.bf16.mxu1 %v4319_v0  ;;  %v42_v42 = vcombine.low %v36_v39, %v37_v40  ;;  %v56_v43 = vrot.slane %v38_v41, %v4456_v25  ;;  %v4871_v39 = vld [vmem:[%s5860_s1 + $0x188] sm:$0xff]   ;;  %v4877_v40 = vld [vmem:[%s5860_s1 + $0x1d0] sm:$0xff]  }
  0x11   :  { %3238 = vmatprep.subr.bf16.mxu0 %v4416_v13  ;;  %v4886_v41 = vld [vmem:[%s5860_s1 + $0x210] sm:$0xff]  }
  0x12   :  { %v49_v44 = vrot.slane %v42_v42, %v4456_v25  ;;  %v4893_v42 = vld [vmem:[%s5860_s1 + $0x190] sm:$0xff]  }
  0x13   :  { %3797 = vmatpush3.bf16.msra.mxu1 %v4422_v17 }
  0x14   :  { %3239 = vmatpush3.bf16.msra.mxu0 %v4429_v18  ;;  %3798 = vmatprep.subr.bf16.mxu1 %v4319_v0  ;;  %v57_v45 = vcombine.low %v49_v44, %v56_v43  ;;  %v4899_v43 = vld [vmem:[%s5860_s1 + $0x1d8] sm:$0xff]  }
  0x15   :  { %3240 = vmatprep.subr.bf16.mxu0 %v4435_v19  ;;  %v4905_v44 = vld [vmem:[%s5860_s1 + $0x218] sm:$0xff]  }
  0x16   :  { %v59_v46 = vsub.f32 %v12_v28, %v57_v45  ;;  %v4744_v28 = vld [vmem:[%s5860_s1 + $0x138] sm:$0xff]  }
  0x17   :  { %3799 = vmatpush3.bf16.msra.mxu1 %v4441_v22  ;;  %v4912_v45 = vld [vmem:[%s5860_s1 + $0x198] sm:$0xff]  }
  0x18   :  { %3241 = vmatpush3.bf16.msra.mxu0 %v4448_v23  ;;  %3800 = vmatprep.subr.bf16.mxu1 %v4319_v0  ;;  %v68_v47 = vrot.slane %v59_v46, %v4456_v25  ;;  %v61_v48 = vcombine.high %v59_v46, %v59_v46 }
  0x19   :  { %3242 = vmatprep.subr.bf16.mxu0 %v4454_v24 }
  0x1a   :  { %v76_v49 = vcombine.high %v68_v47, %v68_v47  ;;  %v75_v50 = vrot.slane %v61_v48, %v4456_v25  ;;  %v4513_v51 = vpack.c.bf16 %v68_v47, %v68_v47  ;;  %v4924_v47 = vld [vmem:[%s5860_s1 + $0x220] sm:$0xff]  }
  0x1b   :  { %3801 = vmatpush3.bf16.msra.mxu1 %v4461_v26  ;;  %v4931_v48 = vld [vmem:[%s5860_s1 + $0x1a0] sm:$0xff]  }
  0x1c   :  { %3243 = vmatpush3.bf16.msra.mxu0 %v4467_v27  ;;  %3802 = vmatprep.subr.bf16.mxu1 %v4319_v0  ;;  %v4515_v52 = vpack.c.bf16 %v76_v49, %v76_v49  ;;  %v4517_v53 = vpack.c.bf16 %v75_v50, %v75_v50  ;;  %v83_v55 = vunpack.c.l.bf16 %v4513_v51  ;;  %v4937_v49 = vld [vmem:[%s5860_s1 + $0x1e8] sm:$0xff]  }
  0x1d   :  { %3244 = vmatprep.subr.bf16.mxu0 %v4478_v29  ;;  %v4943_v50 = vld [vmem:[%s5860_s1 + $0x228] sm:$0xff]  }
  0x1e   :  { %354 = vmatprep.mubr.bf16.mxu0 %v4515_v52  ;;  %v84_v54 = vunpack.c.l.bf16 %v4515_v52  ;;  %v85_v56 = vunpack.c.l.bf16 %v4517_v53 }
  0x1f   :  { %3803 = vmatpush3.bf16.msra.mxu1 %v4485_v32 }
  0x20   :  { %3245 = vmatpush3.bf16.msra.mxu0 %v4495_v36  ;;  %3808 = vmatprep.subr.bf16.mxu1 %v4319_v0  ;;  %v89_v57 = vcombine.low %v83_v55, %v84_v54  ;;  %v103_v59 = vrot.slane %v85_v56, %v4456_v25  ;;  %v4956_v54 = vld [vmem:[%s5860_s1 + $0x1f0] sm:$0xff]  }
  0x21   :  { %3261 = vmatprep.subr.bf16.mxu0 %v4341_v1  ;;  %v4962_v55 = vld [vmem:[%s5860_s1 + $0x230] sm:$0xff]  }
  0x22   :  { %3805 = vmatmul.mubr.bf16.vlgmr.msra.gmra.mrb[0].mxu1 %v4517_v53  ;;  %v96_v58 = vrot.slane %v89_v57, %v4456_v25  ;;  %v4969_v56 = vld [vmem:[%s5860_s1 + $0x1b0] sm:$0xff]   ;;  %v4975_v57 = vld [vmem:[%s5860_s1 + $0x1f8] sm:$0xff]  }
  0x23   :  { %355 = vmatmul.mubr.bf16.vlgmr.msra.gmra.mrb[0].mxu0 %v4513_v51  ;;  %3809 = vmatpush3.bf16.msra.mxu1 %v4348_v2 }
  0x24   :  { %3262 = vmatpush3.bf16.msra.mxu0 %v4354_v3  ;;  %3810 = vmatprep.subr.bf16.mxu1 %v4319_v0  ;;  %v104_v60 = vcombine.low %v96_v58, %v103_v59  ;;  %v4981_v58 = vld [vmem:[%s5860_s1 + $0x238] sm:$0xff]  }
  0x25   :  { %3263 = vmatprep.subr.bf16.mxu0 %v4360_v4  ;;  %434 = vmatprep.mubr.bf16.mxu0 %v4498_v37  ;;  %v4988_v59 = vld [vmem:[%s5860_s1 + $0x1b8] sm:$0xff]  }
  0x26   :  { %3824 = vmatprep.mubr.msk.bf16.mxu1 %vm4320_vm0, %v4319_v0  ;;  %v106_v61 = vsub.f32 %v59_v46, %v104_v60  ;;  %v4918_v46 = vld [vmem:[%s5860_s1 + $0x1e0] sm:$0xff]  }
  0x27   :  { %3811 = vmatpush3.bf16.msra.mxu1 %v4367_v5 }
  0x28   :  { %3264 = vmatpush3.bf16.msra.mxu0 %v4373_v6  ;;  %3812 = vmatprep.subr.bf16.mxu1 %v4319_v0  ;;  %v115_v62 = vrot.slane %v106_v61, %v4456_v25 }
  0x29   :  { %3265 = vmatprep.subr.bf16.mxu0 %v4378_v7 }
  0x2a   :  { %v123_v63 = vcombine.high %v115_v62, %v115_v62 }
  0x2b   :  { %3813 = vmatpush3.bf16.msra.mxu1 %v4384_v8 }
  0x2c   :  { %3266 = vmatpush3.bf16.msra.mxu0 %v4391_v9  ;;  %3814 = vmatprep.subr.bf16.mxu1 %v4319_v0  ;;  %v4564_v14 = vpack.c.bf16 %v123_v63, %v123_v63 }
  0x2d   :  { %3267 = vmatprep.subr.bf16.mxu0 %v4397_v10 }
  0x2f   :  { %3815 = vmatpush3.bf16.msra.mxu1 %v4403_v11 }
  0x30   :  { %3268 = vmatpush3.bf16.msra.mxu0 %v4410_v12  ;;  %3816 = vmatprep.subr.bf16.mxu1 %v4319_v0 }
  0x31   :  { %3269 = vmatprep.subr.bf16.mxu0 %v4416_v13 }
  0x33   :  { %3817 = vmatpush3.bf16.msra.mxu1 %v4422_v17 }
  0x34   :  { %3270 = vmatpush3.bf16.msra.mxu0 %v4429_v18  ;;  %3818 = vmatprep.subr.bf16.mxu1 %v4319_v0 }
  0x35   :  { %3271 = vmatprep.subr.bf16.mxu0 %v4435_v19 }
  0x37   :  { %3819 = vmatpush3.bf16.msra.mxu1 %v4441_v22 }
  0x38   :  { %3272 = vmatpush3.bf16.msra.mxu0 %v4448_v23  ;;  %3820 = vmatprep.subr.bf16.mxu1 %v4319_v0 }
  0x39   :  { %3273 = vmatprep.subr.bf16.mxu0 %v4454_v24 }
  0x3b   :  { %3821 = vmatpush3.bf16.msra.mxu1 %v4461_v26 }
  0x3c   :  { %3274 = vmatpush3.bf16.msra.mxu0 %v4467_v27  ;;  %3822 = vmatprep.subr.bf16.mxu1 %v4319_v0 }
  0x3d   :  { %3275 = vmatprep.subr.bf16.mxu0 %v4478_v29 }
  0x3f   :  { %3823 = vmatpush3.bf16.msra.mxu1 %v4485_v32 }
  0x40   :  { %3276 = vmatpush3.bf16.msra.mxu0 %v4495_v36  ;;  %3828 = vmatprep.subr.bf16.mxu1 %v4319_v0 }
  0x41   :  { %3292 = vmatprep.subr.bf16.mxu0 %v4341_v1  ;;  %v108_v1 = vcombine.high %v106_v61, %v106_v61 }
  0x42   :  { %3825 = vmatmul.mubr.bf16.vlgmr.msra.gmra.mrb[0].mxu1 %v4500_v38 }
  0x43   :  { %435 = vmatmul.mubr.bf16.vlgmr.msra.gmra.mrb[4].mxu0 %v4488_v35  ;;  %3829 = vmatpush3.bf16.msra.mxu1 %v4348_v2  ;;  %v122_v2 = vrot.slane %v108_v1, %v4456_v25 }
  0x44   :  { %3293 = vmatpush3.bf16.msra.mxu0 %v4354_v3  ;;  %3830 = vmatprep.subr.bf16.mxu1 %v4319_v0  ;;  %v4601_v3 = vld [vmem:[%s5860_s1 + $0x100] sm:$0xff]  }
  0x45   :  { %3294 = vmatprep.subr.bf16.mxu0 %v4360_v4  ;;  %3844 = vmatprep.mubr.msk.bf16.mxu1 %vm4320_vm0, %v4319_v0  ;;  %v4607_v4 = vld [vmem:[%s5860_s1 + $0x140] sm:$0xff]  }
  0x46   :  { %514 = vmatprep.mubr.bf16.mxu0 %v4564_v14 }
  0x47   :  { %3831 = vmatpush3.bf16.msra.mxu1 %v4367_v5  ;;  %v4609_v5 = vpack.c.bf16 %v122_v2, %v122_v2 }
  0x48   :  { %3295 = vmatpush3.bf16.msra.mxu0 %v4373_v6  ;;  %3832 = vmatprep.subr.bf16.mxu1 %v4319_v0  ;;  %v4614_v6 = vld [vmem:[%s5860_s1 + $0xc0] sm:$0xff]  }
  0x49   :  { %3296 = vmatprep.subr.bf16.mxu0 %v4378_v7  ;;  %v4617_v7 = vpack.c.bf16 %v115_v62, %v115_v62 }
  0x4b   :  { %3833 = vmatpush3.bf16.msra.mxu1 %v4384_v8  ;;  %v4622_v8 = vld [vmem:[%s5860_s1 + $0x108] sm:$0xff]  }
  0x4c   :  { %3297 = vmatpush3.bf16.msra.mxu0 %v4391_v9  ;;  %3834 = vmatprep.subr.bf16.mxu1 %v4319_v0  ;;  %v4630_v9 = vld [vmem:[%s5860_s1 + $0x148] sm:$0xff]  }
  0x4d   :  { %3298 = vmatprep.subr.bf16.mxu0 %v4397_v10  ;;  %v4636_v10 = vld [vmem:[%s5860_s1 + $0xc8] sm:$0xff]  }
  0x4f   :  { %3835 = vmatpush3.bf16.msra.mxu1 %v4403_v11  ;;  %v4643_v11 = vld [vmem:[%s5860_s1 + $0x110] sm:$0xff]  }
  0x50   :  { %3299 = vmatpush3.bf16.msra.mxu0 %v4410_v12  ;;  %3836 = vmatprep.subr.bf16.mxu1 %v4319_v0  ;;  %v4651_v12 = vld [vmem:[%s5860_s1 + $0x150] sm:$0xff]  }
  0x51   :  { %3300 = vmatprep.subr.bf16.mxu0 %v4416_v13  ;;  %v4657_v13 = vld [vmem:[%s5860_s1 + $0xd0] sm:$0xff]  }
  0x53   :  { %3837 = vmatpush3.bf16.msra.mxu1 %v4422_v17  ;;  %v4681_v17 = vld [vmem:[%s5860_s1 + $0xd8] sm:$0xff]  }
  0x54   :  { %3301 = vmatpush3.bf16.msra.mxu0 %v4429_v18  ;;  %3838 = vmatprep.subr.bf16.mxu1 %v4319_v0  ;;  %v4687_v18 = vld [vmem:[%s5860_s1 + $0x120] sm:$0xff]  }
  0x55   :  { %3302 = vmatprep.subr.bf16.mxu0 %v4435_v19  ;;  %v4693_v19 = vld [vmem:[%s5860_s1 + $0x160] sm:$0xff]  }
  0x57   :  { %3839 = vmatpush3.bf16.msra.mxu1 %v4441_v22  ;;  %v4712_v22 = vld [vmem:[%s5860_s1 + $0x168] sm:$0xff]  }
  0x58   :  { %3303 = vmatpush3.bf16.msra.mxu0 %v4448_v23  ;;  %3840 = vmatprep.subr.bf16.mxu1 %v4319_v0  ;;  %v4719_v23 = vld [vmem:[%s5860_s1 + $0xe8] sm:$0xff]  }
  0x59   :  { %3304 = vmatprep.subr.bf16.mxu0 %v4454_v24  ;;  %v4725_v24 = vld [vmem:[%s5860_s1 + $0x130] sm:$0xff]  }
  0x5b   :  { %3841 = vmatpush3.bf16.msra.mxu1 %v4461_v26  ;;  %v4731_v26 = vld [vmem:[%s5860_s1 + $0x170] sm:$0xff]  }
  0x5c   :  { %3305 = vmatpush3.bf16.msra.mxu0 %v4467_v27  ;;  %3842 = vmatprep.subr.bf16.mxu1 %v4319_v0  ;;  %v4738_v27 = vld [vmem:[%s5860_s1 + $0xf0] sm:$0xff]  }
  0x5d   :  { %3306 = vmatprep.subr.bf16.mxu0 %v4478_v29  ;;  %v4750_v29 = vld [vmem:[%s5860_s1 + $0x178] sm:$0xff]  }
  0x5f   :  { %3843 = vmatpush3.bf16.msra.mxu1 %v4485_v32  ;;  %v4843_v32 = vld [vmem:[%s5860_s1 + $0x200] sm:$0xff]  }
  0x60   :  { %3307 = vmatpush3.bf16.msra.mxu0 %v4495_v36  ;;  %3848 = vmatprep.subr.bf16.mxu1 %v4319_v0  ;;  %v4864_v36 = vld [vmem:[%s5860_s1 + $0x208] sm:$0xff]  }
  0x61   :  { %3323 = vmatprep.subr.bf16.mxu0 %v4601_v3 }
  0x62   :  { %3845 = vmatmul.mubr.bf16.vlgmr.msra.gmra.mrb[0].mxu1 %v4609_v5 }
  0x63   :  { %515 = vmatmul.mubr.bf16.vlgmr.msra.gmra.mrb[8].mxu0 %v4617_v7  ;;  %3849 = vmatpush3.bf16.msra.mxu1 %v4607_v4 }
  0x64   :  { %3324 = vmatpush3.bf16.msra.mxu0 %v4614_v6  ;;  %3850 = vmatprep.subr.bf16.mxu1 %v4319_v0 }
  0x65   :  { %3325 = vmatprep.subr.bf16.mxu0 %v4622_v8  ;;  %788 = vmatprep.mubr.bf16.mxu0 %v4515_v52 }
  0x66   :  { %3864 = vmatprep.mubr.msk.bf16.mxu1 %vm4320_vm0, %v4319_v0 }
  0x67   :  { %3851 = vmatpush3.bf16.msra.mxu1 %v4630_v9 }
  0x68   :  { %3326 = vmatpush3.bf16.msra.mxu0 %v4636_v10  ;;  %3852 = vmatprep.subr.bf16.mxu1 %v4319_v0 }
  0x69   :  { %3327 = vmatprep.subr.bf16.mxu0 %v4643_v11 }
  0x6b   :  { %3853 = vmatpush3.bf16.msra.mxu1 %v4651_v12 }
  0x6c   :  { %3328 = vmatpush3.bf16.msra.mxu0 %v4657_v13  ;;  %3854 = vmatprep.subr.bf16.mxu1 %v4319_v0 }
  0x6d   :  { %3329 = vmatprep.subr.bf16.mxu0 %v4665_v15 }
  0x6f   :  { %3855 = vmatpush3.bf16.msra.mxu1 %v4674_v16 }
  0x70   :  { %3330 = vmatpush3.bf16.msra.mxu0 %v4681_v17  ;;  %3856 = vmatprep.subr.bf16.mxu1 %v4319_v0 }
  0x71   :  { %3331 = vmatprep.subr.bf16.mxu0 %v4687_v18 }
  0x73   :  { %3857 = vmatpush3.bf16.msra.mxu1 %v4693_v19 }
  0x74   :  { %3332 = vmatpush3.bf16.msra.mxu0 %v4700_v20  ;;  %3858 = vmatprep.subr.bf16.mxu1 %v4319_v0 }
  0x75   :  { %3333 = vmatprep.subr.bf16.mxu0 %v4706_v21 }
  0x77   :  { %3859 = vmatpush3.bf16.msra.mxu1 %v4712_v22 }
  0x78   :  { %3334 = vmatpush3.bf16.msra.mxu0 %v4719_v23  ;;  %3860 = vmatprep.subr.bf16.mxu1 %v4319_v0 }
  0x79   :  { %3335 = vmatprep.subr.bf16.mxu0 %v4725_v24 }
  0x7b   :  { %3861 = vmatpush3.bf16.msra.mxu1 %v4731_v26 }
  0x7c   :  { %3336 = vmatpush3.bf16.msra.mxu0 %v4738_v27  ;;  %3862 = vmatprep.subr.bf16.mxu1 %v4319_v0 }
  0x7d   :  { %3337 = vmatprep.subr.bf16.mxu0 %v4744_v28 }
  0x7f   :  { %3863 = vmatpush3.bf16.msra.mxu1 %v4750_v29 }
  0x80   :  { %3338 = vmatpush3.bf16.msra.mxu0 %v4757_v30  ;;  %3868 = vmatprep.subr.bf16.mxu1 %v4319_v0 }
  0x81   :  { %3354 = vmatprep.subr.bf16.mxu0 %v4601_v3 }
  0x82   :  { %3865 = vmatmul.mubr.bf16.vlgmr.msra.gmra.mrb[4].mxu1 %v4517_v53 }
  0x83   :  { %789 = vmatmul.mubr.bf16.vlgmr.msra.gmra.mrb[12].mxu0 %v4513_v51  ;;  %3869 = vmatpush3.bf16.msra.mxu1 %v4607_v4 }
  0x84   :  { %3355 = vmatpush3.bf16.msra.mxu0 %v4614_v6  ;;  %3870 = vmatprep.subr.bf16.mxu1 %v4319_v0 }
  0x85   :  { %3356 = vmatprep.subr.bf16.mxu0 %v4622_v8  ;;  %868 = vmatprep.mubr.bf16.mxu0 %v4498_v37 }
  0x86   :  { %3884 = vmatprep.mubr.msk.bf16.mxu1 %vm4320_vm0, %v4319_v0 }
  0x87   :  { %3871 = vmatpush3.bf16.msra.mxu1 %v4630_v9 }
  0x88   :  { %3357 = vmatpush3.bf16.msra.mxu0 %v4636_v10  ;;  %3872 = vmatprep.subr.bf16.mxu1 %v4319_v0 }
  0x89   :  { %3358 = vmatprep.subr.bf16.mxu0 %v4643_v11 }
  0x8b   :  { %3873 = vmatpush3.bf16.msra.mxu1 %v4651_v12 }
  0x8c   :  { %3359 = vmatpush3.bf16.msra.mxu0 %v4657_v13  ;;  %3874 = vmatprep.subr.bf16.mxu1 %v4319_v0 }
  0x8d   :  { %3360 = vmatprep.subr.bf16.mxu0 %v4665_v15 }
  0x8f   :  { %3875 = vmatpush3.bf16.msra.mxu1 %v4674_v16 }
  0x90   :  { %3361 = vmatpush3.bf16.msra.mxu0 %v4681_v17  ;;  %3876 = vmatprep.subr.bf16.mxu1 %v4319_v0 }
  0x91   :  { %3362 = vmatprep.subr.bf16.mxu0 %v4687_v18 }
  0x93   :  { %3877 = vmatpush3.bf16.msra.mxu1 %v4693_v19 }
  0x94   :  { %3363 = vmatpush3.bf16.msra.mxu0 %v4700_v20  ;;  %3878 = vmatprep.subr.bf16.mxu1 %v4319_v0 }
  0x95   :  { %3364 = vmatprep.subr.bf16.mxu0 %v4706_v21 }
  0x97   :  { %3879 = vmatpush3.bf16.msra.mxu1 %v4712_v22 }
  0x98   :  { %3365 = vmatpush3.bf16.msra.mxu0 %v4719_v23  ;;  %3880 = vmatprep.subr.bf16.mxu1 %v4319_v0 }
  0x99   :  { %3366 = vmatprep.subr.bf16.mxu0 %v4725_v24 }
  0x9b   :  { %3881 = vmatpush3.bf16.msra.mxu1 %v4731_v26 }
  0x9c   :  { %3367 = vmatpush3.bf16.msra.mxu0 %v4738_v27  ;;  %3882 = vmatprep.subr.bf16.mxu1 %v4319_v0 }
  0x9d   :  { %3368 = vmatprep.subr.bf16.mxu0 %v4744_v28 }
  0x9f   :  { %3883 = vmatpush3.bf16.msra.mxu1 %v4750_v29 }
  0xa0   :  { %3369 = vmatpush3.bf16.msra.mxu0 %v4757_v30  ;;  %3888 = vmatprep.subr.bf16.mxu1 %v4319_v0 }
  0xa1   :  { %3385 = vmatprep.subr.bf16.mxu0 %v4601_v3 }
  0xa2   :  { %3885 = vmatmul.mubr.bf16.vlgmr.msra.gmra.mrb[8].mxu1 %v4500_v38 }
  0xa3   :  { %869 = vmatmul.mubr.bf16.vlgmr.msra.gmra.mrb[16].mxu0 %v4488_v35  ;;  %3889 = vmatpush3.bf16.msra.mxu1 %v4607_v4 }
  0xa4   :  { %3386 = vmatpush3.bf16.msra.mxu0 %v4614_v6  ;;  %3890 = vmatprep.subr.bf16.mxu1 %v4319_v0 }
  0xa5   :  { %3387 = vmatprep.subr.bf16.mxu0 %v4622_v8  ;;  %948 = vmatprep.mubr.bf16.mxu0 %v4564_v14 }
  0xa6   :  { %3904 = vmatprep.mubr.msk.bf16.mxu1 %vm4320_vm0, %v4319_v0 }
  0xa7   :  { %3891 = vmatpush3.bf16.msra.mxu1 %v4630_v9 }
  0xa8   :  { %3388 = vmatpush3.bf16.msra.mxu0 %v4636_v10  ;;  %3892 = vmatprep.subr.bf16.mxu1 %v4319_v0 }
  0xa9   :  { %3389 = vmatprep.subr.bf16.mxu0 %v4643_v11 }
  0xab   :  { %3893 = vmatpush3.bf16.msra.mxu1 %v4651_v12 }
  0xac   :  { %3390 = vmatpush3.bf16.msra.mxu0 %v4657_v13  ;;  %3894 = vmatprep.subr.bf16.mxu1 %v4319_v0 }
  0xad   :  { %3391 = vmatprep.subr.bf16.mxu0 %v4665_v15 }
  0xaf   :  { %3895 = vmatpush3.bf16.msra.mxu1 %v4674_v16 }
  0xb0   :  { %3392 = vmatpush3.bf16.msra.mxu0 %v4681_v17  ;;  %3896 = vmatprep.subr.bf16.mxu1 %v4319_v0 }
  0xb1   :  { %3393 = vmatprep.subr.bf16.mxu0 %v4687_v18 }
  0xb3   :  { %3897 = vmatpush3.bf16.msra.mxu1 %v4693_v19 }
  0xb4   :  { %3394 = vmatpush3.bf16.msra.mxu0 %v4700_v20  ;;  %3898 = vmatprep.subr.bf16.mxu1 %v4319_v0 }
  0xb5   :  { %3395 = vmatprep.subr.bf16.mxu0 %v4706_v21 }
  0xb7   :  { %3899 = vmatpush3.bf16.msra.mxu1 %v4712_v22  ;;  %v5095_v22 = vld [vmem:[%s5860_s1 + $0x40] sm:$0xff]  }
  0xb8   :  { %3396 = vmatpush3.bf16.msra.mxu0 %v4719_v23  ;;  %3900 = vmatprep.subr.bf16.mxu1 %v4319_v0 }
  0xb9   :  { %3397 = vmatprep.subr.bf16.mxu0 %v4725_v24  ;;  %v5103_v24 = vld [vmem:[%s5860_s1 + $0x80] sm:$0xff]  }
  0xbb   :  { %3901 = vmatpush3.bf16.msra.mxu1 %v4731_v26  ;;  %v5110_v26 = vld [vmem:[%s5860_s1] sm:$0xff]  }
  0xbc   :  { %3398 = vmatpush3.bf16.msra.mxu0 %v4738_v27  ;;  %3902 = vmatprep.subr.bf16.mxu1 %v4319_v0  ;;  %v5116_v27 = vld [vmem:[%s5860_s1 + $0x48] sm:$0xff]  }
  0xbd   :  { %3399 = vmatprep.subr.bf16.mxu0 %v4744_v28 }
  0xbf   :  { %3903 = vmatpush3.bf16.msra.mxu1 %v4750_v29  ;;  %v5126_v29 = vld [vmem:[%s5860_s1 + $0x88] sm:$0xff]  }
  0xc0   :  { %3400 = vmatpush3.bf16.msra.mxu0 %v4757_v30  ;;  %3908 = vmatprep.subr.bf16.mxu1 %v4319_v0  ;;  %v5133_v30 = vld [vmem:[%s5860_s1 + $0x8] sm:$0xff]  }
  0xc1   :  { %3416 = vmatprep.subr.bf16.mxu0 %v4837_v31 }
  0xc2   :  { %3905 = vmatmul.mubr.bf16.vlgmr.msra.gmra.mrb[12].mxu1 %v4609_v5 }
  0xc3   :  { %949 = vmatmul.mubr.bf16.vlgmr.msra.gmra.mrb[20].mxu0 %v4617_v7  ;;  %3909 = vmatpush3.bf16.msra.mxu1 %v4843_v32 }
  0xc4   :  { %3417 = vmatpush3.bf16.msra.mxu0 %v4850_v33  ;;  %3910 = vmatprep.subr.bf16.mxu1 %v4319_v0 }
  0xc5   :  { %3418 = vmatprep.subr.bf16.mxu0 %v4856_v34  ;;  %1223 = vmatprep.mubr.bf16.mxu0 %v4515_v52  ;;  %v4950_v52 = vld [vmem:[%s5860_s1 + $0x1a8] sm:$0xff]  }
  0xc6   :  { %3924 = vmatprep.mubr.msk.bf16.mxu1 %vm4320_vm0, %v4319_v0 }
  0xc7   :  { %3911 = vmatpush3.bf16.msra.mxu1 %v4864_v36 }
  0xc8   :  { %3419 = vmatpush3.bf16.msra.mxu0 %v4871_v39  ;;  %3912 = vmatprep.subr.bf16.mxu1 %v4319_v0 }
  0xc9   :  { %3420 = vmatprep.subr.bf16.mxu0 %v4877_v40 }
  0xcb   :  { %3913 = vmatpush3.bf16.msra.mxu1 %v4886_v41 }
  0xcc   :  { %3421 = vmatpush3.bf16.msra.mxu0 %v4893_v42  ;;  %3914 = vmatprep.subr.bf16.mxu1 %v4319_v0 }
  0xcd   :  { %3422 = vmatprep.subr.bf16.mxu0 %v4899_v43 }
  0xcf   :  { %3915 = vmatpush3.bf16.msra.mxu1 %v4905_v44 }
  0xd0   :  { %3423 = vmatpush3.bf16.msra.mxu0 %v4912_v45  ;;  %3916 = vmatprep.subr.bf16.mxu1 %v4319_v0 }
  0xd1   :  { %3424 = vmatprep.subr.bf16.mxu0 %v4918_v46 }
  0xd3   :  { %3917 = vmatpush3.bf16.msra.mxu1 %v4924_v47 }
  0xd4   :  { %3425 = vmatpush3.bf16.msra.mxu0 %v4931_v48  ;;  %3918 = vmatprep.subr.bf16.mxu1 %v4319_v0 }
  0xd5   :  { %3426 = vmatprep.subr.bf16.mxu0 %v4937_v49 }
  0xd7   :  { %3919 = vmatpush3.bf16.msra.mxu1 %v4943_v50 }
  0xd8   :  { %3427 = vmatpush3.bf16.msra.mxu0 %v4950_v52  ;;  %3920 = vmatprep.subr.bf16.mxu1 %v4319_v0 }
  0xd9   :  { %3428 = vmatprep.subr.bf16.mxu0 %v4956_v54 }
  0xdb   :  { %3921 = vmatpush3.bf16.msra.mxu1 %v4962_v55 }
  0xdc   :  { %3429 = vmatpush3.bf16.msra.mxu0 %v4969_v56  ;;  %3922 = vmatprep.subr.bf16.mxu1 %v4319_v0 }
  0xdd   :  { %3430 = vmatprep.subr.bf16.mxu0 %v4975_v57 }
  0xdf   :  { %3923 = vmatpush3.bf16.msra.mxu1 %v4981_v58 }
  0xe0   :  { %3431 = vmatpush3.bf16.msra.mxu0 %v4988_v59  ;;  %3928 = vmatprep.subr.bf16.mxu1 %v4319_v0 }
  0xe1   :  { %3447 = vmatprep.subr.bf16.mxu0 %v4837_v31 }
  0xe2   :  { %3925 = vmatmul.mubr.bf16.vlgmr.msra.gmra.mrb[16].mxu1 %v4517_v53 }
  0xe3   :  { %1224 = vmatmul.mubr.bf16.vlgmr.msra.gmra.mrb[24].mxu0 %v4513_v51  ;;  %3929 = vmatpush3.bf16.msra.mxu1 %v4843_v32  ;;  %v3056_v51 = vld [vmem:[%s5861_s0 + $0x6] sm:$0x3f] }
  0xe4   :  { %3448 = vmatpush3.bf16.msra.mxu0 %v4850_v33  ;;  %3930 = vmatprep.subr.bf16.mxu1 %v4319_v0  ;;  %v1456_v63 = vrot.slane %v3056_v51, %v4456_v25  ;;  %v1449_v1 = vcombine.high %v3056_v51, %v3056_v51 }
  0xe5   :  { %3449 = vmatprep.subr.bf16.mxu0 %v4856_v34  ;;  %1303 = vmatprep.mubr.bf16.mxu0 %v4498_v37 }
  0xe6   :  { %3944 = vmatprep.mubr.msk.bf16.mxu1 %vm4320_vm0, %v4319_v0  ;;  %v1464_v2 = vcombine.high %v1456_v63, %v1456_v63  ;;  %v1463_v3 = vrot.slane %v1449_v1, %v4456_v25  ;;  %v5039_v4 = vpack.c.bf16 %v1456_v63, %v1456_v63 }
  0xe7   :  { %3931 = vmatpush3.bf16.msra.mxu1 %v4864_v36 }
  0xe8   :  { %3450 = vmatpush3.bf16.msra.mxu0 %v4871_v39  ;;  %3932 = vmatprep.subr.bf16.mxu1 %v4319_v0  ;;  %v5041_v6 = vpack.c.bf16 %v1464_v2, %v1464_v2  ;;  %v5050_v8 = vpack.c.bf16 %v1463_v3, %v1463_v3  ;;  %v1471_v9 = vunpack.c.l.bf16 %v5039_v4 }
  0xe9   :  { %3451 = vmatprep.subr.bf16.mxu0 %v4877_v40 }
  0xea   :  { %v1472_v10 = vunpack.c.l.bf16 %v5041_v6 }
  0xeb   :  { %3933 = vmatpush3.bf16.msra.mxu1 %v4886_v41 }
  0xec   :  { %3452 = vmatpush3.bf16.msra.mxu0 %v4893_v42  ;;  %3934 = vmatprep.subr.bf16.mxu1 %v4319_v0 }
  0xed   :  { %3453 = vmatprep.subr.bf16.mxu0 %v4899_v43 }
  0xef   :  { %3935 = vmatpush3.bf16.msra.mxu1 %v4905_v44 }
  0xf0   :  { %3454 = vmatpush3.bf16.msra.mxu0 %v4912_v45  ;;  %3936 = vmatprep.subr.bf16.mxu1 %v4319_v0 }
  0xf1   :  { %3455 = vmatprep.subr.bf16.mxu0 %v4918_v46 }
  0xf3   :  { %3937 = vmatpush3.bf16.msra.mxu1 %v4924_v47 }
  0xf4   :  { %3456 = vmatpush3.bf16.msra.mxu0 %v4931_v48  ;;  %3938 = vmatprep.subr.bf16.mxu1 %v4319_v0 }
  0xf5   :  { %3457 = vmatprep.subr.bf16.mxu0 %v4937_v49 }
  0xf6   :  { %v3246_v37 = vpop.f32.mrb[0].mxu0 }
  0xf7   :  { %v3247_v53 = vpop.f32.mrb[1].mxu0  ;;  %3939 = vmatpush3.bf16.msra.mxu1 %v4943_v50 }
  0xf8   :  { %v5024_v60 = vadd.f32 %v3247_v53, %v3246_v37  ;;  %v3249_v61 = vpop.f32.mrb[2].mxu0  ;;  %3458 = vmatpush3.bf16.msra.mxu0 %v4950_v52  ;;  %3940 = vmatprep.subr.bf16.mxu1 %v4319_v0  ;;  %v5247_v53 = vld [vmem:[%s5860_s1 + $0xb8] sm:$0xff]  }
  0xf9   :  { %v3250_v62 = vpop.f32.mrb[3].mxu0  ;;  %3459 = vmatprep.subr.bf16.mxu0 %v4956_v54  ;;  %v5256_v61 = vld [vmem:[%s5860_s1 + $0x38] sm:$0xff]  }
  0xfb   :  { %3941 = vmatpush3.bf16.msra.mxu1 %v4962_v55 }
  0xfc   :  { %3460 = vmatpush3.bf16.msra.mxu0 %v4969_v56  ;;  %3942 = vmatprep.subr.bf16.mxu1 %v4319_v0 }
  0xfd   :  { %3461 = vmatprep.subr.bf16.mxu0 %v4975_v57 }
  0xff   :  { %3943 = vmatpush3.bf16.msra.mxu1 %v4981_v58 }
 0x100   :  { %3462 = vmatpush3.bf16.msra.mxu0 %v4988_v59  ;;  %3948 = vmatprep.subr.bf16.mxu1 %v4319_v0 }
 0x101   :  { %3478 = vmatprep.subr.bf16.mxu0 %v4837_v31  ;;  %v5155_v31 = vld [vmem:[%s5860_s1 + $0x10] sm:$0xff]  }
 0x102   :  { %3945 = vmatmul.mubr.bf16.vlgmr.msra.gmra.mrb[20].mxu1 %v4500_v38  ;;  %v1477_v38 = vcombine.low %v1471_v9, %v1472_v10 }
 0x103   :  { %1304 = vmatmul.mubr.bf16.vlgmr.msra.gmra.mrb[28].mxu0 %v4488_v35  ;;  %3949 = vmatpush3.bf16.msra.mxu1 %v4843_v32  ;;  %v1473_v35 = vunpack.c.l.bf16 %v5050_v8  ;;  %v5161_v32 = vld [vmem:[%s5860_s1 + $0x58] sm:$0xff]  }
 0x104   :  { %3479 = vmatpush3.bf16.msra.mxu0 %v4850_v33  ;;  %3950 = vmatprep.subr.bf16.mxu1 %v4319_v0  ;;  %v5167_v33 = vld [vmem:[%s5860_s1 + $0x98] sm:$0xff]  }
 0x105   :  { %3480 = vmatprep.subr.bf16.mxu0 %v4856_v34  ;;  %1383 = vmatprep.mubr.bf16.mxu0 %v4564_v14  ;;  %v1484_v14 = vrot.slane %v1477_v38, %v4456_v25  ;;  %v1491_v11 = vrot.slane %v1473_v35, %v4456_v25  ;;  %v5174_v34 = vld [vmem:[%s5860_s1 + $0x18] sm:$0xff]  }
 0x106   :  { %3964 = vmatprep.mubr.msk.bf16.mxu1 %vm4320_vm0, %v4319_v0 }
 0x107   :  { %3951 = vmatpush3.bf16.msra.mxu1 %v4864_v36  ;;  %v1492_v12 = vcombine.low %v1484_v14, %v1491_v11  ;;  %v5180_v36 = vld [vmem:[%s5860_s1 + $0x60] sm:$0xff]  }
 0x108   :  { %3481 = vmatpush3.bf16.msra.mxu0 %v4871_v39  ;;  %3952 = vmatprep.subr.bf16.mxu1 %v4319_v0  ;;  %v5186_v39 = vld [vmem:[%s5860_s1 + $0xa0] sm:$0xff]  }
 0x109   :  { %3482 = vmatprep.subr.bf16.mxu0 %v4877_v40  ;;  %v5075_v13 = vsub.f32 %v3056_v51, %v1492_v12  ;;  %v5193_v40 = vld [vmem:[%s5860_s1 + $0x20] sm:$0xff]  }
 0x10b   :  { %3953 = vmatpush3.bf16.msra.mxu1 %v4886_v41  ;;  %v5083_v20 = vrot.slane %v5075_v13, %v4456_v25  ;;  %v5199_v41 = vld [vmem:[%s5860_s1 + $0x68] sm:$0xff]  }
 0x10c   :  { %3483 = vmatpush3.bf16.msra.mxu0 %v4893_v42  ;;  %3954 = vmatprep.subr.bf16.mxu1 %v4319_v0  ;;  %v5205_v42 = vld [vmem:[%s5860_s1 + $0xa8] sm:$0xff]  }
 0x10d   :  { %3484 = vmatprep.subr.bf16.mxu0 %v4899_v43  ;;  %v1511_v23 = vcombine.high %v5083_v20, %v5083_v20  ;;  %v5212_v43 = vld [vmem:[%s5860_s1 + $0x28] sm:$0xff]   ;;  %v5264_v63 = vpack.c.bf16 %v5083_v20, %v5083_v20 }
 0x10f   :  { %3955 = vmatpush3.bf16.msra.mxu1 %v4905_v44  ;;  %v5118_v28 = vpack.c.bf16 %v1511_v23, %v1511_v23  ;;  %v1518_v2 = vunpack.c.l.bf16 %v5264_v63 }
 0x110   :  { %3485 = vmatpush3.bf16.msra.mxu0 %v4912_v45  ;;  %3956 = vmatprep.subr.bf16.mxu1 %v4319_v0  ;;  %v5218_v45 = vld [vmem:[%s5860_s1 + $0x70] sm:$0xff]  }
 0x111   :  { %3486 = vmatprep.subr.bf16.mxu0 %v4918_v46  ;;  %v1519_v1 = vunpack.c.l.bf16 %v5118_v28 }
 0x113   :  { %3957 = vmatpush3.bf16.msra.mxu1 %v4924_v47  ;;  %v1524_v9 = vcombine.low %v1518_v2, %v1519_v1 }
 0x114   :  { %3487 = vmatpush3.bf16.msra.mxu0 %v4931_v48  ;;  %3958 = vmatprep.subr.bf16.mxu1 %v4319_v0  ;;  %v1496_v48 = vcombine.high %v5075_v13, %v5075_v13 }
 0x115   :  { %3488 = vmatprep.subr.bf16.mxu0 %v4937_v49  ;;  %v1531_v10 = vrot.slane %v1524_v9, %v4456_v25 }
 0x116   :  { %v3277_v15 = vpop.f32.mrb[4].mxu0  ;;  %v1510_v51 = vrot.slane %v1496_v48, %v4456_v25  ;;  %v5403_v48 = vld [vmem:[%s5860_s1 + $0x110] sm:$0xff]  }
 0x117   :  { %v3278_v16 = vpop.f32.mrb[5].mxu0  ;;  %3959 = vmatpush3.bf16.msra.mxu1 %v4943_v50 }
 0x118   :  { %v3279_v17 = vadd.f32 %v3278_v16, %v3277_v15  ;;  %v3280_v18 = vpop.f32.mrb[6].mxu0  ;;  %3489 = vmatpush3.bf16.msra.mxu0 %v4950_v52  ;;  %3960 = vmatprep.subr.bf16.mxu1 %v4319_v0  ;;  %v5226_v52 = vld [vmem:[%s5860_s1 + $0xb0] sm:$0xff]   ;;  %v5259_v62 = vpack.c.bf16 %v1510_v51, %v1510_v51  ;;  %v5476_v51 = vld [vmem:[%s5860_s1 + $0xe8] sm:$0xff]  }
 0x119   :  { %v3281_v19 = vpop.f32.mrb[7].mxu0  ;;  %3490 = vmatprep.subr.bf16.mxu0 %v4956_v54 }
 0x11a   :  { %v5086_v21 = vadd.f32 %v3279_v17, %v5024_v60  ;;  %v1520_v3 = vunpack.c.l.bf16 %v5259_v62 }
 0x11b   :  { %3961 = vmatpush3.bf16.msra.mxu1 %v4962_v55 }
 0x11c   :  { %3491 = vmatpush3.bf16.msra.mxu0 %v4969_v56  ;;  %3962 = vmatprep.subr.bf16.mxu1 %v4319_v0  ;;  %v1538_v35 = vrot.slane %v1520_v3, %v4456_v25 }
 0x11d   :  { %3492 = vmatprep.subr.bf16.mxu0 %v4975_v57  ;;  %v5233_v57 = vld [vmem:[%s5860_s1 + $0x30] sm:$0xff]  }
 0x11e   :  { %v1539_v38 = vcombine.low %v1531_v10, %v1538_v35  ;;  %v5488_v10 = vld [vmem:[%s5860_s1 + $0x170] sm:$0xff]  }
 0x11f   :  { %3963 = vmatpush3.bf16.msra.mxu1 %v4981_v58 }
 0x120   :  { %3493 = vmatpush3.bf16.msra.mxu0 %v4988_v59  ;;  %3968 = vmatprep.subr.bf16.mxu1 %v4319_v0  ;;  %v5239_v59 = vld [vmem:[%s5860_s1 + $0x78] sm:$0xff]   ;;  %v5300_v15 = vsub.f32 %v5075_v13, %v1539_v38 }
 0x121   :  { %3509 = vmatprep.subr.bf16.mxu0 %v5095_v22 }
 0x122   :  { %3965 = vmatmul.mubr.bf16.vlgmr.msra.gmra.mrb[24].mxu1 %v4609_v5  ;;  %v5139_v5 = vld [vmem:[%s5860_s1 + $0x50] sm:$0xff]  }
 0x123   :  { %1384 = vmatmul.mubr.bf16.vlgmr.msra.gmra.mrb[32].mxu0 %v4617_v7  ;;  %3969 = vmatpush3.bf16.msra.mxu1 %v5103_v24  ;;  %v5148_v7 = vld [vmem:[%s5860_s1 + $0x90] sm:$0xff]  }
 0x124   :  { %3510 = vmatpush3.bf16.msra.mxu0 %v5110_v26  ;;  %3970 = vmatprep.subr.bf16.mxu1 %v4319_v0 }
 0x125   :  { %3511 = vmatprep.subr.bf16.mxu0 %v5116_v27  ;;  %1789 = vmatprep.mubr.bf16.mxu0 %v5118_v28 }
 0x126   :  { %3984 = vmatprep.mubr.msk.bf16.mxu1 %vm4320_vm0, %v4319_v0 }
 0x127   :  { %3971 = vmatpush3.bf16.msra.mxu1 %v5126_v29 }
 0x128   :  { %3512 = vmatpush3.bf16.msra.mxu0 %v5133_v30  ;;  %3972 = vmatprep.subr.bf16.mxu1 %v4319_v0 }
 0x129   :  { %3513 = vmatprep.subr.bf16.mxu0 %v5139_v5 }
 0x12b   :  { %3973 = vmatpush3.bf16.msra.mxu1 %v5148_v7 }
 0x12c   :  { %3514 = vmatpush3.bf16.msra.mxu0 %v5155_v31  ;;  %3974 = vmatprep.subr.bf16.mxu1 %v4319_v0 }
 0x12d   :  { %3515 = vmatprep.subr.bf16.mxu0 %v5161_v32 }
 0x12f   :  { %3975 = vmatpush3.bf16.msra.mxu1 %v5167_v33 }
 0x130   :  { %3516 = vmatpush3.bf16.msra.mxu0 %v5174_v34  ;;  %3976 = vmatprep.subr.bf16.mxu1 %v4319_v0 }
 0x131   :  { %3517 = vmatprep.subr.bf16.mxu0 %v5180_v36 }
 0x133   :  { %3977 = vmatpush3.bf16.msra.mxu1 %v5186_v39 }
 0x134   :  { %3518 = vmatpush3.bf16.msra.mxu0 %v5193_v40  ;;  %3978 = vmatprep.subr.bf16.mxu1 %v4319_v0 }
 0x135   :  { %v556_v44 = vpop.f32.mrb[0].mxu1  ;;  %3519 = vmatprep.subr.bf16.mxu0 %v5199_v41 }
 0x136   :  { %v3308_v46 = vpop.f32.mrb[8].mxu0  ;;  %v3846_v47 = vpop.f32.mrb[1].mxu1 }
 0x137   :  { %v3309_v49 = vpop.f32.mrb[9].mxu0  ;;  %v559_v50 = vpop.f32.mrb[2].mxu1  ;;  %3979 = vmatpush3.bf16.msra.mxu1 %v5205_v42  ;;  %v5397_v47 = vld [vmem:[%s5860_s1 + $0xc8] sm:$0xff]  }
 0x138   :  { %v3310_v54 = vadd.f32 %v3309_v49, %v3308_v46  ;;  %v3311_v55 = vpop.f32.mrb[10].mxu0  ;;  %v3847_v56 = vpop.f32.mrb[3].mxu1  ;;  %3520 = vmatpush3.bf16.msra.mxu0 %v5212_v43  ;;  %3980 = vmatprep.subr.bf16.mxu1 %v4319_v0  ;;  %v5412_v49 = vld [vmem:[%s5860_s1 + $0x150] sm:$0xff]  }
 0x139   :  { %v3312_v58 = vpop.f32.mrb[11].mxu0  ;;  %3521 = vmatprep.subr.bf16.mxu0 %v5218_v45  ;;  %v5419_v50 = vld [vmem:[%s5860_s1 + $0xd0] sm:$0xff]   ;;  %v5438_v55 = vld [vmem:[%s5860_s1 + $0xd8] sm:$0xff]   ;;  %v5444_v56 = vld [vmem:[%s5860_s1 + $0x120] sm:$0xff]  }
 0x13a   :  { %v4149_v37 = vadd.f32 %v5086_v21, %v3310_v54  ;;  %v5431_v54 = vld [vmem:[%s5860_s1 + $0x158] sm:$0xff]   ;;  %v5457_v58 = vld [vmem:[%s5860_s1 + $0xe0] sm:$0xff]  }
 0x13b   :  { %3981 = vmatpush3.bf16.msra.mxu1 %v5226_v52 }
 0x13c   :  { %v5249_v60 = vadd.f32 %v4149_v37, %v556_v44  ;;  %3522 = vmatpush3.bf16.msra.mxu0 %v5233_v57  ;;  %3982 = vmatprep.subr.bf16.mxu1 %v4319_v0  ;;  %v1550_v44 = vrot.slane %v5300_v15, %v4456_v25  ;;  %v5469_v37 = vld [vmem:[%s5860_s1 + $0x168] sm:$0xff]  }
 0x13d   :  { %3523 = vmatprep.subr.bf16.mxu0 %v5239_v59 }
 0x13e   :  { %v1558_v13 = vcombine.high %v1550_v44, %v1550_v44 }
 0x13f   :  { %3983 = vmatpush3.bf16.msra.mxu1 %v5247_v53 }
 0x140   :  { %3524 = vmatpush3.bf16.msra.mxu0 %v5256_v61  ;;  %3988 = vmatprep.subr.bf16.mxu1 %v4319_v0  ;;  %v5317_v46 = vpack.c.bf16 %v1558_v13, %v1558_v13 }
 0x141   :  { %3540 = vmatprep.subr.bf16.mxu0 %v5095_v22 }
 0x142   :  { %3985 = vmatmul.mubr.bf16.vlgmr.msra.gmra.mrb[28].mxu1 %v5259_v62 }
 0x143   :  { %1790 = vmatmul.mubr.bf16.vlgmr.msra.gmra.mrb[36].mxu0 %v5264_v63  ;;  %3989 = vmatpush3.bf16.msra.mxu1 %v5103_v24 }
 0x144   :  { %3541 = vmatpush3.bf16.msra.mxu0 %v5110_v26  ;;  %3990 = vmatprep.subr.bf16.mxu1 %v4319_v0 }
 0x145   :  { %3542 = vmatprep.subr.bf16.mxu0 %v5116_v27  ;;  %1869 = vmatprep.mubr.bf16.mxu0 %v5041_v6 }
 0x146   :  { %4004 = vmatprep.mubr.msk.bf16.mxu1 %vm4320_vm0, %v4319_v0 }
 0x147   :  { %3991 = vmatpush3.bf16.msra.mxu1 %v5126_v29 }
 0x148   :  { %3543 = vmatpush3.bf16.msra.mxu0 %v5133_v30  ;;  %3992 = vmatprep.subr.bf16.mxu1 %v4319_v0 }
 0x149   :  { %3544 = vmatprep.subr.bf16.mxu0 %v5139_v5 }
 0x14b   :  { %3993 = vmatpush3.bf16.msra.mxu1 %v5148_v7 }
 0x14c   :  { %3545 = vmatpush3.bf16.msra.mxu0 %v5155_v31  ;;  %3994 = vmatprep.subr.bf16.mxu1 %v4319_v0 }
 0x14d   :  { %3546 = vmatprep.subr.bf16.mxu0 %v5161_v32 }
 0x14f   :  { %3995 = vmatpush3.bf16.msra.mxu1 %v5167_v33 }
 0x150   :  { %3547 = vmatpush3.bf16.msra.mxu0 %v5174_v34  ;;  %3996 = vmatprep.subr.bf16.mxu1 %v4319_v0 }
 0x151   :  { %3548 = vmatprep.subr.bf16.mxu0 %v5180_v36 }
 0x153   :  { %3997 = vmatpush3.bf16.msra.mxu1 %v5186_v39 }
 0x154   :  { %3549 = vmatpush3.bf16.msra.mxu0 %v5193_v40  ;;  %3998 = vmatprep.subr.bf16.mxu1 %v4319_v0 }
 0x155   :  { %v830_v14 = vpop.f32.mrb[4].mxu1  ;;  %3550 = vmatprep.subr.bf16.mxu0 %v5199_v41 }
 0x156   :  { %v3339_v11 = vpop.f32.mrb[12].mxu0  ;;  %v3866_v12 = vpop.f32.mrb[5].mxu1 }
 0x157   :  { %v3340_v16 = vpop.f32.mrb[13].mxu0  ;;  %3999 = vmatpush3.bf16.msra.mxu1 %v5205_v42  ;;  %v833_v17 = vpop.f32.mrb[6].mxu1 }
 0x158   :  { %v3341_v18 = vadd.f32 %v3340_v16, %v3339_v11  ;;  %v3342_v19 = vpop.f32.mrb[14].mxu0  ;;  %3551 = vmatpush3.bf16.msra.mxu0 %v5212_v43  ;;  %v3867_v20 = vpop.f32.mrb[7].mxu1  ;;  %4000 = vmatprep.subr.bf16.mxu1 %v4319_v0  ;;  %v5495_v11 = vld [vmem:[%s5860_s1 + $0xf0] sm:$0xff]   ;;  %v5507_v17 = vld [vmem:[%s5860_s1 + $0x178] sm:$0xff]  }
 0x159   :  { %v3343_v21 = vpop.f32.mrb[15].mxu0  ;;  %3552 = vmatprep.subr.bf16.mxu0 %v5218_v45  ;;  %v5515_v19 = vld [vmem:[%s5860_s1 + $0xf8] sm:$0xff]  }
 0x15a   :  { %v831_v23 = vadd.f32 %v3341_v18, %v830_v14 }
 0x15b   :  { %4001 = vmatpush3.bf16.msra.mxu1 %v5226_v52 }
 0x15c   :  { %3553 = vmatpush3.bf16.msra.mxu0 %v5233_v57  ;;  %4002 = vmatprep.subr.bf16.mxu1 %v4319_v0 }
 0x15d   :  { %3554 = vmatprep.subr.bf16.mxu0 %v5239_v59 }
 0x15f   :  { %4003 = vmatpush3.bf16.msra.mxu1 %v5247_v53 }
 0x160   :  { %3555 = vmatpush3.bf16.msra.mxu0 %v5256_v61  ;;  %4008 = vmatprep.subr.bf16.mxu1 %v4319_v0 }
 0x161   :  { %3571 = vmatprep.subr.bf16.mxu0 %v5095_v22 }
 0x162   :  { %4005 = vmatmul.mubr.bf16.vlgmr.msra.gmra.mrb[28].mxu1 %v5050_v8 }
 0x163   :  { %1870 = vmatmul.mubr.bf16.vlgmr.msra.gmra.mrb[40].mxu0 %v5039_v4  ;;  %4009 = vmatpush3.bf16.msra.mxu1 %v5103_v24 }
 0x164   :  { %3572 = vmatpush3.bf16.msra.mxu0 %v5110_v26  ;;  %4010 = vmatprep.subr.bf16.mxu1 %v4319_v0 }
 0x165   :  { %3573 = vmatprep.subr.bf16.mxu0 %v5116_v27  ;;  %4024 = vmatprep.mubr.msk.bf16.mxu1 %vm4320_vm0, %v4319_v0  ;;  %v1543_v27 = vcombine.high %v5300_v15, %v5300_v15  ;;  %v5501_v15 = vld [vmem:[%s5860_s1 + $0x138] sm:$0xff]  }
 0x166   :  { %1949 = vmatprep.mubr.bf16.mxu0 %v5317_v46 }
 0x167   :  { %4011 = vmatpush3.bf16.msra.mxu1 %v5126_v29 }
 0x168   :  { %3574 = vmatpush3.bf16.msra.mxu0 %v5133_v30  ;;  %4012 = vmatprep.subr.bf16.mxu1 %v4319_v0 }
 0x169   :  { %3575 = vmatprep.subr.bf16.mxu0 %v5139_v5 }
 0x16b   :  { %4013 = vmatpush3.bf16.msra.mxu1 %v5148_v7 }
 0x16c   :  { %3576 = vmatpush3.bf16.msra.mxu0 %v5155_v31  ;;  %4014 = vmatprep.subr.bf16.mxu1 %v4319_v0 }
 0x16d   :  { %3577 = vmatprep.subr.bf16.mxu0 %v5161_v32 }
 0x16f   :  { %4015 = vmatpush3.bf16.msra.mxu1 %v5167_v33 }
 0x170   :  { %3578 = vmatpush3.bf16.msra.mxu0 %v5174_v34  ;;  %4016 = vmatprep.subr.bf16.mxu1 %v4319_v0  ;;  %v1557_v34 = vrot.slane %v1543_v27, %v4456_v25  ;;  %v5364_v25 = vpack.c.bf16 %v1550_v44, %v1550_v44 }
 0x171   :  { %3579 = vmatprep.subr.bf16.mxu0 %v5180_v36 }
 0x173   :  { %4017 = vmatpush3.bf16.msra.mxu1 %v5186_v39  ;;  %v5359_v39 = vld [vmem:[%s5860_s1 + $0x100] sm:$0xff]  }
 0x174   :  { %3580 = vmatpush3.bf16.msra.mxu0 %v5193_v40  ;;  %4018 = vmatprep.subr.bf16.mxu1 %v4319_v0  ;;  %v5361_v40 = vpack.c.bf16 %v1557_v34, %v1557_v34 }
 0x175   :  { %v910_v22 = vpop.f32.mrb[8].mxu1  ;;  %3581 = vmatprep.subr.bf16.mxu0 %v5199_v41  ;;  %v5369_v41 = vld [vmem:[%s5860_s1 + $0x140] sm:$0xff]  }
 0x176   :  { %v3370_v24 = vpop.f32.mrb[16].mxu0  ;;  %v3886_v26 = vpop.f32.mrb[9].mxu1 }
 0x177   :  { %v3371_v29 = vpop.f32.mrb[17].mxu0  ;;  %4019 = vmatpush3.bf16.msra.mxu1 %v5205_v42  ;;  %v913_v30 = vpop.f32.mrb[10].mxu1  ;;  %v5376_v42 = vld [vmem:[%s5860_s1 + $0xc0] sm:$0xff]  }
 0x178   :  { %v3372_v5 = vadd.f32 %v3371_v29, %v3370_v24  ;;  %v3373_v7 = vpop.f32.mrb[18].mxu0  ;;  %3582 = vmatpush3.bf16.msra.mxu0 %v5212_v43  ;;  %v3887_v31 = vpop.f32.mrb[11].mxu1  ;;  %4020 = vmatprep.subr.bf16.mxu1 %v4319_v0  ;;  %v5382_v43 = vld [vmem:[%s5860_s1 + $0x108] sm:$0xff]  }
 0x179   :  { %v3374_v32 = vpop.f32.mrb[19].mxu0  ;;  %3583 = vmatprep.subr.bf16.mxu0 %v5218_v45  ;;  %v5390_v45 = vld [vmem:[%s5860_s1 + $0x148] sm:$0xff]  }
 0x17a   :  { %v871_v33 = vadd.f32 %v3372_v5, %v831_v23 }
 0x17b   :  { %4021 = vmatpush3.bf16.msra.mxu1 %v5226_v52  ;;  %v5425_v52 = vld [vmem:[%s5860_s1 + $0x118] sm:$0xff]  }
 0x17c   :  { %v5351_v36 = vadd.f32 %v910_v22, %v871_v33  ;;  %3584 = vmatpush3.bf16.msra.mxu0 %v5233_v57  ;;  %4022 = vmatprep.subr.bf16.mxu1 %v4319_v0  ;;  %v5450_v57 = vld [vmem:[%s5860_s1 + $0x160] sm:$0xff]  }
 0x17d   :  { %3585 = vmatprep.subr.bf16.mxu0 %v5239_v59  ;;  %v5463_v59 = vld [vmem:[%s5860_s1 + $0x128] sm:$0xff]  }
 0x17f   :  { %4023 = vmatpush3.bf16.msra.mxu1 %v5247_v53 }
 0x180   :  { %3586 = vmatpush3.bf16.msra.mxu0 %v5256_v61  ;;  %4028 = vmatprep.subr.bf16.mxu1 %v4319_v0  ;;  %v5482_v61 = vld [vmem:[%s5860_s1 + $0x130] sm:$0xff]  }
 0x181   :  { %3602 = vmatprep.subr.bf16.mxu0 %v5359_v39 }
 0x182   :  { %4025 = vmatmul.mubr.bf16.vlgmr.msra.gmra.mrb[28].mxu1 %v5361_v40 }
 0x183   :  { %1950 = vmatmul.mubr.bf16.vlgmr.msra.gmra.mrb[44].mxu0 %v5364_v25  ;;  %4029 = vmatpush3.bf16.msra.mxu1 %v5369_v41 }
 0x184   :  { %3603 = vmatpush3.bf16.msra.mxu0 %v5376_v42  ;;  %4030 = vmatprep.subr.bf16.mxu1 %v4319_v0 }
 0x185   :  { %3604 = vmatprep.subr.bf16.mxu0 %v5382_v43  ;;  %2222 = vmatprep.mubr.bf16.mxu0 %v5118_v28 }
 0x186   :  { %4044 = vmatprep.mubr.msk.bf16.mxu1 %vm4320_vm0, %v4319_v0 }
 0x187   :  { %4031 = vmatpush3.bf16.msra.mxu1 %v5390_v45 }
 0x188   :  { %3605 = vmatpush3.bf16.msra.mxu0 %v5397_v47  ;;  %4032 = vmatprep.subr.bf16.mxu1 %v4319_v0 }
 0x189   :  { %3606 = vmatprep.subr.bf16.mxu0 %v5403_v48 }
 0x18b   :  { %4033 = vmatpush3.bf16.msra.mxu1 %v5412_v49 }
 0x18c   :  { %3607 = vmatpush3.bf16.msra.mxu0 %v5419_v50  ;;  %4034 = vmatprep.subr.bf16.mxu1 %v4319_v0 }
 0x18d   :  { %3608 = vmatprep.subr.bf16.mxu0 %v5425_v52 }
 0x18f   :  { %4035 = vmatpush3.bf16.msra.mxu1 %v5431_v54 }
 0x190   :  { %3609 = vmatpush3.bf16.msra.mxu0 %v5438_v55  ;;  %4036 = vmatprep.subr.bf16.mxu1 %v4319_v0 }
 0x191   :  { %3610 = vmatprep.subr.bf16.mxu0 %v5444_v56 }
 0x193   :  { %4037 = vmatpush3.bf16.msra.mxu1 %v5450_v57 }
 0x194   :  { %3611 = vmatpush3.bf16.msra.mxu0 %v5457_v58  ;;  %4038 = vmatprep.subr.bf16.mxu1 %v4319_v0 }
 0x195   :  { %v990_v53 = vpop.f32.mrb[12].mxu1  ;;  %3612 = vmatprep.subr.bf16.mxu0 %v5463_v59 }
 0x196   :  { %v3401_v1 = vpop.f32.mrb[20].mxu0  ;;  %v3906_v2 = vpop.f32.mrb[13].mxu1 }
 0x197   :  { %v3402_v3 = vpop.f32.mrb[21].mxu0  ;;  %4039 = vmatpush3.bf16.msra.mxu1 %v5469_v37  ;;  %v993_v9 = vpop.f32.mrb[14].mxu1  ;;  %v5710_v2 = vld [vmem:[%s5860_s1 + $0x228] sm:$0xff]  }
 0x198   :  { %v3403_v35 = vadd.f32 %v3402_v3, %v3401_v1  ;;  %v3404_v38 = vpop.f32.mrb[22].mxu0  ;;  %3613 = vmatpush3.bf16.msra.mxu0 %v5476_v51  ;;  %v3907_v14 = vpop.f32.mrb[15].mxu1  ;;  %4040 = vmatprep.subr.bf16.mxu1 %v4319_v0  ;;  %v5704_v1 = vld [vmem:[%s5860_s1 + $0x1e8] sm:$0xff]  }
 0x199   :  { %v3405_v12 = vpop.f32.mrb[23].mxu0  ;;  %3614 = vmatprep.subr.bf16.mxu0 %v5482_v61  ;;  %v5717_v3 = vld [vmem:[%s5860_s1 + $0x1a8] sm:$0xff]  }
 0x19a   :  { %v991_v16 = vadd.f32 %v3403_v35, %v990_v53  ;;  %v5691_v53 = vld [vmem:[%s5860_s1 + $0x220] sm:$0xff]   ;;  %v5729_v12 = vld [vmem:[%s5860_s1 + $0x230] sm:$0xff]  }
 0x19b   :  { %4041 = vmatpush3.bf16.msra.mxu1 %v5488_v10 }
 0x19c   :  { %v996_v18 = vadd.f32 %v991_v16, %v5351_v36  ;;  %3615 = vmatpush3.bf16.msra.mxu0 %v5495_v11  ;;  %4042 = vmatprep.subr.bf16.mxu1 %v4319_v0 }
 0x19d   :  { %3616 = vmatprep.subr.bf16.mxu0 %v5501_v15 }
 0x19e   :  { %v5518_v20 = vadd.f32 -128.0, %v996_v18  ;;  %v5736_v18 = vld [vmem:[%s5860_s1 + $0x1b0] sm:$0xff]  }
 0x19f   :  { %4043 = vmatpush3.bf16.msra.mxu1 %v5507_v17 }
 0x1a0   :  { %v1442_v21 = vmul.f32 1.772, %v5518_v20  ;;  %3617 = vmatpush3.bf16.msra.mxu0 %v5515_v19  ;;  %4048 = vmatprep.subr.bf16.mxu1 %v4319_v0 }
 0x1a1   :  { %3633 = vmatprep.subr.bf16.mxu0 %v5359_v39 }
 0x1a2   :  { %v1443_v23 = vadd.f32 %v5249_v60, %v1442_v21  ;;  %4045 = vmatmul.mubr.bf16.vlgmr.msra.gmra.mrb[32].mxu1 %v5259_v62  ;;  %v5742_v21 = vld [vmem:[%s5860_s1 + $0x1f8] sm:$0xff]  }
 0x1a3   :  { %2223 = vmatmul.mubr.bf16.vlgmr.msra.gmra.mrb[48].mxu0 %v5264_v63  ;;  %4049 = vmatpush3.bf16.msra.mxu1 %v5369_v41 }
 0x1a4   :  { %3055 = vst [vmem:[%s5862_s2 + $0x4] sm:$0x3] %v1443_v23  ;;  %3634 = vmatpush3.bf16.msra.mxu0 %v5376_v42  ;;  %4050 = vmatprep.subr.bf16.mxu1 %v4319_v0 }
 0x1a5   :  { %3635 = vmatprep.subr.bf16.mxu0 %v5382_v43  ;;  %2302 = vmatprep.mubr.bf16.mxu0 %v5041_v6 }
 0x1a6   :  { %4064 = vmatprep.mubr.msk.bf16.mxu1 %vm4320_vm0, %v4319_v0 }
 0x1a7   :  { %4051 = vmatpush3.bf16.msra.mxu1 %v5390_v45 }
 0x1a8   :  { %3636 = vmatpush3.bf16.msra.mxu0 %v5397_v47  ;;  %4052 = vmatprep.subr.bf16.mxu1 %v4319_v0 }
 0x1a9   :  { %3637 = vmatprep.subr.bf16.mxu0 %v5403_v48 }
 0x1ab   :  { %4053 = vmatpush3.bf16.msra.mxu1 %v5412_v49 }
 0x1ac   :  { %3638 = vmatpush3.bf16.msra.mxu0 %v5419_v50  ;;  %4054 = vmatprep.subr.bf16.mxu1 %v4319_v0 }
 0x1ad   :  { %3639 = vmatprep.subr.bf16.mxu0 %v5425_v52 }
 0x1af   :  { %4055 = vmatpush3.bf16.msra.mxu1 %v5431_v54 }
 0x1b0   :  { %3640 = vmatpush3.bf16.msra.mxu0 %v5438_v55  ;;  %4056 = vmatprep.subr.bf16.mxu1 %v4319_v0 }
 0x1b1   :  { %3641 = vmatprep.subr.bf16.mxu0 %v5444_v56 }
 0x1b3   :  { %4057 = vmatpush3.bf16.msra.mxu1 %v5450_v57 }
 0x1b4   :  { %3642 = vmatpush3.bf16.msra.mxu0 %v5457_v58  ;;  %4058 = vmatprep.subr.bf16.mxu1 %v4319_v0 }
 0x1b5   :  { %v1265_v44 = vpop.f32.mrb[16].mxu1  ;;  %3643 = vmatprep.subr.bf16.mxu0 %v5463_v59 }
 0x1b6   :  { %v3432_v13 = vpop.f32.mrb[24].mxu0  ;;  %v3926_v22 = vpop.f32.mrb[17].mxu1 }
 0x1b7   :  { %v3433_v24 = vpop.f32.mrb[25].mxu0  ;;  %4059 = vmatpush3.bf16.msra.mxu1 %v5469_v37  ;;  %v1268_v26 = vpop.f32.mrb[18].mxu1 }
 0x1b8   :  { %v3434_v27 = vadd.f32 %v3433_v24, %v3432_v13  ;;  %v3435_v29 = vpop.f32.mrb[26].mxu0  ;;  %3644 = vmatpush3.bf16.msra.mxu0 %v5476_v51  ;;  %v3927_v30 = vpop.f32.mrb[19].mxu1  ;;  %4060 = vmatprep.subr.bf16.mxu1 %v4319_v0  ;;  %v1436_v13 = vmul.f32 0.344136, %v5518_v20  ;;  %v5757_v24 = vld [vmem:[%s5860_s1 + $0x1b8] sm:$0xff]  }
 0x1b9   :  { %v3436_v5 = vpop.f32.mrb[27].mxu0  ;;  %3645 = vmatprep.subr.bf16.mxu0 %v5482_v61 }
 0x1ba   :  { %v1266_v7 = vadd.f32 %v3434_v27, %v1265_v44  ;;  %v5748_v44 = vld [vmem:[%s5860_s1 + $0x238] sm:$0xff]   ;;  %v1437_v27 = vsub.f32 %v5249_v60, %v1436_v13 }
 0x1bb   :  { %4061 = vmatpush3.bf16.msra.mxu1 %v5488_v10 }
 0x1bc   :  { %3646 = vmatpush3.bf16.msra.mxu0 %v5495_v11  ;;  %4062 = vmatprep.subr.bf16.mxu1 %v4319_v0 }
 0x1bd   :  { %3647 = vmatprep.subr.bf16.mxu0 %v5501_v15 }
 0x1bf   :  { %4063 = vmatpush3.bf16.msra.mxu1 %v5507_v17 }
 0x1c0   :  { %3648 = vmatpush3.bf16.msra.mxu0 %v5515_v19  ;;  %4068 = vmatprep.subr.bf16.mxu1 %v4319_v0 }
 0x1c1   :  { %3664 = vmatprep.subr.bf16.mxu0 %v5359_v39 }
 0x1c2   :  { %4065 = vmatmul.mubr.bf16.vlgmr.msra.gmra.mrb[36].mxu1 %v5050_v8 }
 0x1c3   :  { %2303 = vmatmul.mubr.bf16.vlgmr.msra.gmra.mrb[52].mxu0 %v5039_v4  ;;  %4069 = vmatpush3.bf16.msra.mxu1 %v5369_v41 }
 0x1c4   :  { %3665 = vmatpush3.bf16.msra.mxu0 %v5376_v42  ;;  %4070 = vmatprep.subr.bf16.mxu1 %v4319_v0 }
 0x1c5   :  { %3666 = vmatprep.subr.bf16.mxu0 %v5382_v43  ;;  %2382 = vmatprep.mubr.bf16.mxu0 %v5317_v46 }
 0x1c6   :  { %4084 = vmatprep.mubr.msk.bf16.mxu1 %vm4320_vm0, %v4319_v0 }
 0x1c7   :  { %4071 = vmatpush3.bf16.msra.mxu1 %v5390_v45 }
 0x1c8   :  { %3667 = vmatpush3.bf16.msra.mxu0 %v5397_v47  ;;  %4072 = vmatprep.subr.bf16.mxu1 %v4319_v0 }
 0x1c9   :  { %3668 = vmatprep.subr.bf16.mxu0 %v5403_v48  ;;  %v5604_v48 = vld [vmem:[%s5860_s1 + $0x1c0] sm:$0xff]  }
 0x1cb   :  { %4073 = vmatpush3.bf16.msra.mxu1 %v5412_v49  ;;  %v5610_v49 = vld [vmem:[%s5860_s1 + $0x200] sm:$0xff]  }
 0x1cc   :  { %3669 = vmatpush3.bf16.msra.mxu0 %v5419_v50  ;;  %4074 = vmatprep.subr.bf16.mxu1 %v4319_v0  ;;  %v5617_v50 = vld [vmem:[%s5860_s1 + $0x180] sm:$0xff]  }
 0x1cd   :  { %3670 = vmatprep.subr.bf16.mxu0 %v5425_v52  ;;  %v5623_v52 = vld [vmem:[%s5860_s1 + $0x1c8] sm:$0xff]  }
 0x1cf   :  { %4075 = vmatpush3.bf16.msra.mxu1 %v5431_v54  ;;  %v5631_v54 = vld [vmem:[%s5860_s1 + $0x208] sm:$0xff]  }
 0x1d0   :  { %3671 = vmatpush3.bf16.msra.mxu0 %v5438_v55  ;;  %4076 = vmatprep.subr.bf16.mxu1 %v4319_v0  ;;  %v5638_v55 = vld [vmem:[%s5860_s1 + $0x188] sm:$0xff]  }
 0x1d1   :  { %3672 = vmatprep.subr.bf16.mxu0 %v5444_v56  ;;  %v5644_v56 = vld [vmem:[%s5860_s1 + $0x1d0] sm:$0xff]  }
 0x1d3   :  { %4077 = vmatpush3.bf16.msra.mxu1 %v5450_v57  ;;  %v5653_v57 = vld [vmem:[%s5860_s1 + $0x210] sm:$0xff]  }
 0x1d4   :  { %3673 = vmatpush3.bf16.msra.mxu0 %v5457_v58  ;;  %4078 = vmatprep.subr.bf16.mxu1 %v4319_v0  ;;  %v5660_v58 = vld [vmem:[%s5860_s1 + $0x190] sm:$0xff]  }
 0x1d5   :  { %v1345_v31 = vpop.f32.mrb[20].mxu1  ;;  %3674 = vmatprep.subr.bf16.mxu0 %v5463_v59  ;;  %v5672_v59 = vld [vmem:[%s5860_s1 + $0x218] sm:$0xff]  }
 0x1d6   :  { %v3463_v32 = vpop.f32.mrb[28].mxu0  ;;  %v3946_v33 = vpop.f32.mrb[21].mxu1 }
 0x1d7   :  { %v3464_v34 = vpop.f32.mrb[29].mxu0  ;;  %4079 = vmatpush3.bf16.msra.mxu1 %v5469_v37  ;;  %v1348_v36 = vpop.f32.mrb[22].mxu1  ;;  %v5679_v37 = vld [vmem:[%s5860_s1 + $0x198] sm:$0xff]  }
 0x1d8   :  { %v3465_v39 = vadd.f32 %v3464_v34, %v3463_v32  ;;  %v3466_v41 = vpop.f32.mrb[30].mxu0  ;;  %3675 = vmatpush3.bf16.msra.mxu0 %v5476_v51  ;;  %v3947_v42 = vpop.f32.mrb[23].mxu1  ;;  %4080 = vmatprep.subr.bf16.mxu1 %v4319_v0  ;;  %v5685_v51 = vld [vmem:[%s5860_s1 + $0x1e0] sm:$0xff]  }
 0x1d9   :  { %v3467_v43 = vpop.f32.mrb[31].mxu0  ;;  %3676 = vmatprep.subr.bf16.mxu0 %v5482_v61  ;;  %v5698_v61 = vld [vmem:[%s5860_s1 + $0x1a0] sm:$0xff]  }
 0x1da   :  { %v1306_v45 = vadd.f32 %v3465_v39, %v1266_v7 }
 0x1db   :  { %4081 = vmatpush3.bf16.msra.mxu1 %v5488_v10  ;;  %v5723_v10 = vld [vmem:[%s5860_s1 + $0x1f0] sm:$0xff]  }
 0x1dc   :  { %v5596_v47 = vadd.f32 %v1345_v31, %v1306_v45  ;;  %3677 = vmatpush3.bf16.msra.mxu0 %v5495_v11  ;;  %4082 = vmatprep.subr.bf16.mxu1 %v4319_v0 }
 0x1dd   :  { %3678 = vmatprep.subr.bf16.mxu0 %v5501_v15 }
 0x1df   :  { %4083 = vmatpush3.bf16.msra.mxu1 %v5507_v17 }
 0x1e0   :  { %3679 = vmatpush3.bf16.msra.mxu0 %v5515_v19  ;;  %4088 = vmatprep.subr.bf16.mxu1 %v4319_v0 }
 0x1e1   :  { %3695 = vmatprep.subr.bf16.mxu0 %v5604_v48 }
 0x1e2   :  { %4085 = vmatmul.mubr.bf16.vlgmr.msra.gmra.mrb[40].mxu1 %v5361_v40 }
 0x1e3   :  { %2383 = vmatmul.mubr.bf16.vlgmr.msra.gmra.mrb[56].mxu0 %v5364_v25  ;;  %4089 = vmatpush3.bf16.msra.mxu1 %v5610_v49 }
 0x1e4   :  { %3696 = vmatpush3.bf16.msra.mxu0 %v5617_v50  ;;  %4090 = vmatprep.subr.bf16.mxu1 %v4319_v0 }
 0x1e5   :  { %3697 = vmatprep.subr.bf16.mxu0 %v5623_v52  ;;  %2656 = vmatprep.mubr.bf16.mxu0 %v5118_v28  ;;  %v5666_v28 = vld [vmem:[%s5860_s1 + $0x1d8] sm:$0xff]  }
 0x1e6   :  { %4104 = vmatprep.mubr.msk.bf16.mxu1 %vm4320_vm0, %v4319_v0 }
 0x1e7   :  { %4091 = vmatpush3.bf16.msra.mxu1 %v5631_v54 }
 0x1e8   :  { %3698 = vmatpush3.bf16.msra.mxu0 %v5638_v55  ;;  %4092 = vmatprep.subr.bf16.mxu1 %v4319_v0 }
 0x1e9   :  { %3699 = vmatprep.subr.bf16.mxu0 %v5644_v56 }
 0x1eb   :  { %4093 = vmatpush3.bf16.msra.mxu1 %v5653_v57 }
 0x1ec   :  { %3700 = vmatpush3.bf16.msra.mxu0 %v5660_v58  ;;  %4094 = vmatprep.subr.bf16.mxu1 %v4319_v0 }
 0x1ed   :  { %3701 = vmatprep.subr.bf16.mxu0 %v5666_v28 }
 0x1ef   :  { %4095 = vmatpush3.bf16.msra.mxu1 %v5672_v59 }
 0x1f0   :  { %3702 = vmatpush3.bf16.msra.mxu0 %v5679_v37  ;;  %4096 = vmatprep.subr.bf16.mxu1 %v4319_v0 }
 0x1f1   :  { %3703 = vmatprep.subr.bf16.mxu0 %v5685_v51 }
 0x1f3   :  { %4097 = vmatpush3.bf16.msra.mxu1 %v5691_v53 }
 0x1f4   :  { %3704 = vmatpush3.bf16.msra.mxu0 %v5698_v61  ;;  %4098 = vmatprep.subr.bf16.mxu1 %v4319_v0 }
 0x1f5   :  { %v1425_v9 = vpop.f32.mrb[24].mxu1  ;;  %3705 = vmatprep.subr.bf16.mxu0 %v5704_v1 }
 0x1f6   :  { %v3494_v35 = vpop.f32.mrb[32].mxu0  ;;  %v3966_v38 = vpop.f32.mrb[25].mxu1 }
 0x1f7   :  { %v3495_v14 = vpop.f32.mrb[33].mxu0  ;;  %4099 = vmatpush3.bf16.msra.mxu1 %v5710_v2  ;;  %v1428_v11 = vpop.f32.mrb[26].mxu1 }
 0x1f8   :  { %v3496_v15 = vadd.f32 %v3495_v14, %v3494_v35  ;;  %v3497_v16 = vpop.f32.mrb[34].mxu0  ;;  %3706 = vmatpush3.bf16.msra.mxu0 %v5717_v3  ;;  %v3967_v17 = vpop.f32.mrb[27].mxu1  ;;  %4100 = vmatprep.subr.bf16.mxu1 %v4319_v0 }
 0x1f9   :  { %v3498_v19 = vpop.f32.mrb[35].mxu0  ;;  %3707 = vmatprep.subr.bf16.mxu0 %v5723_v10 }
 0x1fa   :  { %v1426_v23 = vadd.f32 %v3496_v15, %v1425_v9 }
 0x1fb   :  { %4101 = vmatpush3.bf16.msra.mxu1 %v5729_v12 }
 0x1fc   :  { %v1431_v22 = vadd.f32 %v1426_v23, %v5596_v47  ;;  %3708 = vmatpush3.bf16.msra.mxu0 %v5736_v18  ;;  %4102 = vmatprep.subr.bf16.mxu1 %v4319_v0 }
 0x1fd   :  { %3709 = vmatprep.subr.bf16.mxu0 %v5742_v21 }
 0x1fe   :  { %v3053_v26 = vadd.f32 -128.0, %v1431_v22 }
 0x1ff   :  { %4103 = vmatpush3.bf16.msra.mxu1 %v5748_v44 }
 0x200   :  { %v1433_v29 = vmul.f32 1.402, %v3053_v26  ;;  %v1438_v20 = vmul.f32 0.714136, %v3053_v26  ;;  %3710 = vmatpush3.bf16.msra.mxu0 %v5757_v24  ;;  %4108 = vmatprep.subr.bf16.mxu1 %v4319_v0 }
 0x201   :  { %3726 = vmatprep.subr.bf16.mxu0 %v5604_v48 }
 0x202   :  { %v1434_v30 = vadd.f32 %v5249_v60, %v1433_v29  ;;  %v1439_v5 = vsub.f32 %v1437_v27, %v1438_v20  ;;  %4105 = vmatmul.mubr.bf16.vlgmr.msra.gmra.mrb[44].mxu1 %v5259_v62 }
 0x203   :  { %2657 = vmatmul.mubr.bf16.vlgmr.msra.gmra.mrb[60].mxu0 %v5264_v63  ;;  %4109 = vmatpush3.bf16.msra.mxu1 %v5610_v49 }
 0x204   :  { %1435 = vst [vmem:[%s5862_s2] sm:$0x3] %v1434_v30  ;;  %3054 = vst [vmem:[%s5862_s2 + $0x2] sm:$0x3] %v1439_v5  ;;  %3727 = vmatpush3.bf16.msra.mxu0 %v5617_v50  ;;  %4110 = vmatprep.subr.bf16.mxu1 %v4319_v0 }
 0x205   :  { %3728 = vmatprep.subr.bf16.mxu0 %v5623_v52  ;;  %2736 = vmatprep.mubr.bf16.mxu0 %v5041_v6 }
 0x206   :  { %4124 = vmatprep.mubr.msk.bf16.mxu1 %vm4320_vm0, %v4319_v0 }
 0x207   :  { %4111 = vmatpush3.bf16.msra.mxu1 %v5631_v54 }
 0x208   :  { %3729 = vmatpush3.bf16.msra.mxu0 %v5638_v55  ;;  %4112 = vmatprep.subr.bf16.mxu1 %v4319_v0 }
 0x209   :  { %3730 = vmatprep.subr.bf16.mxu0 %v5644_v56 }
 0x20b   :  { %4113 = vmatpush3.bf16.msra.mxu1 %v5653_v57 }
 0x20c   :  { %3731 = vmatpush3.bf16.msra.mxu0 %v5660_v58  ;;  %4114 = vmatprep.subr.bf16.mxu1 %v4319_v0 }
 0x20d   :  { %3732 = vmatprep.subr.bf16.mxu0 %v5666_v28 }
 0x20f   :  { %4115 = vmatpush3.bf16.msra.mxu1 %v5672_v59 }
 0x210   :  { %3733 = vmatpush3.bf16.msra.mxu0 %v5679_v37  ;;  %4116 = vmatprep.subr.bf16.mxu1 %v4319_v0 }
 0x211   :  { %3734 = vmatprep.subr.bf16.mxu0 %v5685_v51 }
 0x213   :  { %4117 = vmatpush3.bf16.msra.mxu1 %v5691_v53 }
 0x214   :  { %3735 = vmatpush3.bf16.msra.mxu0 %v5698_v61  ;;  %4118 = vmatprep.subr.bf16.mxu1 %v4319_v0 }
 0x215   :  { %3736 = vmatprep.subr.bf16.mxu0 %v5704_v1 }
 0x216   :  { %v3525_v6 = vpop.f32.mrb[36].mxu0 }
 0x217   :  { %v3526_v60 = vpop.f32.mrb[37].mxu0  ;;  %4119 = vmatpush3.bf16.msra.mxu1 %v5710_v2 }
 0x218   :  { %v3527_v62 = vadd.f32 %v3526_v60, %v3525_v6  ;;  %v3528_v63 = vpop.f32.mrb[38].mxu0  ;;  %3737 = vmatpush3.bf16.msra.mxu0 %v5717_v3  ;;  %4120 = vmatprep.subr.bf16.mxu1 %v4319_v0 }
 0x219   :  { %v3529_v7 = vpop.f32.mrb[39].mxu0  ;;  %3738 = vmatprep.subr.bf16.mxu0 %v5723_v10 }
 0x21b   :  { %4121 = vmatpush3.bf16.msra.mxu1 %v5729_v12 }
 0x21c   :  { %3739 = vmatpush3.bf16.msra.mxu0 %v5736_v18  ;;  %4122 = vmatprep.subr.bf16.mxu1 %v4319_v0 }
 0x21d   :  { %3740 = vmatprep.subr.bf16.mxu0 %v5742_v21 }
 0x21f   :  { %4123 = vmatpush3.bf16.msra.mxu1 %v5748_v44 }
 0x220   :  { %3741 = vmatpush3.bf16.msra.mxu0 %v5757_v24  ;;  %4128 = vmatprep.subr.bf16.mxu1 %v4319_v0 }
 0x221   :  { %3757 = vmatprep.subr.bf16.mxu0 %v5604_v48 }
 0x222   :  { %4125 = vmatmul.mubr.bf16.vlgmr.msra.gmra.mrb[48].mxu1 %v5050_v8 }
 0x223   :  { %2737 = vmatmul.mubr.bf16.vlgmr.msra.gmra.mrb[64].mxu0 %v5039_v4  ;;  %4129 = vmatpush3.bf16.msra.mxu1 %v5610_v49 }
 0x224   :  { %3758 = vmatpush3.bf16.msra.mxu0 %v5617_v50  ;;  %4130 = vmatprep.subr.bf16.mxu1 %v4319_v0 }
 0x225   :  { %3759 = vmatprep.subr.bf16.mxu0 %v5623_v52  ;;  %2816 = vmatprep.mubr.bf16.mxu0 %v5317_v46 }
 0x226   :  { %4144 = vmatprep.mubr.msk.bf16.mxu1 %vm4320_vm0, %v4319_v0 }
 0x227   :  { %4131 = vmatpush3.bf16.msra.mxu1 %v5631_v54 }
 0x228   :  { %3760 = vmatpush3.bf16.msra.mxu0 %v5638_v55  ;;  %4132 = vmatprep.subr.bf16.mxu1 %v4319_v0 }
 0x229   :  { %3761 = vmatprep.subr.bf16.mxu0 %v5644_v56 }
 0x22b   :  { %4133 = vmatpush3.bf16.msra.mxu1 %v5653_v57 }
 0x22c   :  { %3762 = vmatpush3.bf16.msra.mxu0 %v5660_v58  ;;  %4134 = vmatprep.subr.bf16.mxu1 %v4319_v0 }
 0x22d   :  { %3763 = vmatprep.subr.bf16.mxu0 %v5666_v28 }
 0x22f   :  { %4135 = vmatpush3.bf16.msra.mxu1 %v5672_v59 }
 0x230   :  { %3764 = vmatpush3.bf16.msra.mxu0 %v5679_v37  ;;  %4136 = vmatprep.subr.bf16.mxu1 %v4319_v0 }
 0x231   :  { %3765 = vmatprep.subr.bf16.mxu0 %v5685_v51 }
 0x233   :  { %4137 = vmatpush3.bf16.msra.mxu1 %v5691_v53 }
 0x234   :  { %3766 = vmatpush3.bf16.msra.mxu0 %v5698_v61  ;;  %4138 = vmatprep.subr.bf16.mxu1 %v4319_v0 }
 0x235   :  { %3767 = vmatprep.subr.bf16.mxu0 %v5704_v1 }
 0x236   :  { %v3556_v4 = vpop.f32.mrb[40].mxu0 }
 0x237   :  { %v3557_v8 = vpop.f32.mrb[41].mxu0  ;;  %4139 = vmatpush3.bf16.msra.mxu1 %v5710_v2 }
 0x238   :  { %v3558_v46 = vadd.f32 %v3557_v8, %v3556_v4  ;;  %v3559_v31 = vpop.f32.mrb[42].mxu0  ;;  %3768 = vmatpush3.bf16.msra.mxu0 %v5717_v3  ;;  %4140 = vmatprep.subr.bf16.mxu1 %v4319_v0 }
 0x239   :  { %v3560_v32 = vpop.f32.mrb[43].mxu0  ;;  %3769 = vmatprep.subr.bf16.mxu0 %v5723_v10 }
 0x23a   :  { %v4151_v33 = vadd.f32 %v3558_v46, %v3527_v62 }
 0x23b   :  { %4141 = vmatpush3.bf16.msra.mxu1 %v5729_v12 }
 0x23c   :  { %3770 = vmatpush3.bf16.msra.mxu0 %v5736_v18  ;;  %4142 = vmatprep.subr.bf16.mxu1 %v4319_v0 }
 0x23d   :  { %3771 = vmatprep.subr.bf16.mxu0 %v5742_v21 }
 0x23f   :  { %4143 = vmatpush3.bf16.msra.mxu1 %v5748_v44 }
 0x240   :  { %3772 = vmatpush3.bf16.msra.mxu0 %v5757_v24 }
 0x242   :  { %4145 = vmatmul.mubr.bf16.vlgmr.msra.gmra.mrb[52].mxu1 %v5361_v40 }
 0x243   :  { %2817 = vmatmul.mubr.bf16.vlgmr.msra.gmra.mrb[68].mxu0 %v5364_v25 }
 0x255   :  { %v1991_v34 = vpop.f32.mrb[28].mxu1 }
 0x256   :  { %v3587_v36 = vpop.f32.mrb[44].mxu0  ;;  %v4026_v39 = vpop.f32.mrb[29].mxu1 }
 0x257   :  { %v3588_v41 = vpop.f32.mrb[45].mxu0  ;;  %v1994_v42 = vpop.f32.mrb[30].mxu1 }
 0x258   :  { %v3589_v43 = vadd.f32 %v3588_v41, %v3587_v36  ;;  %v3590_v45 = vpop.f32.mrb[46].mxu0  ;;  %v4027_v47 = vpop.f32.mrb[31].mxu1 }
 0x259   :  { %v3591_v48 = vpop.f32.mrb[47].mxu0 }
 0x25a   :  { %v4152_v0 = vadd.f32 %v4151_v33, %v3589_v43 }
 0x25c   :  { %v5846_v49 = vadd.f32 %v4152_v0, %v1991_v34 }
 0x275   :  { %v2264_v50 = vpop.f32.mrb[32].mxu1 }
 0x276   :  { %v3618_v52 = vpop.f32.mrb[48].mxu0  ;;  %v4046_v54 = vpop.f32.mrb[33].mxu1 }
 0x277   :  { %v3619_v55 = vpop.f32.mrb[49].mxu0  ;;  %v2267_v56 = vpop.f32.mrb[34].mxu1 }
 0x278   :  { %v3620_v40 = vadd.f32 %v3619_v55, %v3618_v52  ;;  %v3621_v57 = vpop.f32.mrb[50].mxu0  ;;  %v4047_v25 = vpop.f32.mrb[35].mxu1 }
 0x279   :  { %v3622_v58 = vpop.f32.mrb[51].mxu0 }
 0x27a   :  { %v2265_v28 = vadd.f32 %v3620_v40, %v2264_v50 }
 0x295   :  { %v2344_v59 = vpop.f32.mrb[36].mxu1 }
 0x296   :  { %v3649_v37 = vpop.f32.mrb[52].mxu0  ;;  %v4066_v51 = vpop.f32.mrb[37].mxu1 }
 0x297   :  { %v3650_v53 = vpop.f32.mrb[53].mxu0  ;;  %v2347_v61 = vpop.f32.mrb[38].mxu1 }
 0x298   :  { %v3651_v1 = vadd.f32 %v3650_v53, %v3649_v37  ;;  %v3652_v2 = vpop.f32.mrb[54].mxu0  ;;  %v4067_v3 = vpop.f32.mrb[39].mxu1 }
 0x299   :  { %v3653_v9 = vpop.f32.mrb[55].mxu0 }
 0x29a   :  { %v2305_v10 = vadd.f32 %v3651_v1, %v2265_v28 }
 0x29c   :  { %v2345_v35 = vadd.f32 %v2344_v59, %v2305_v10 }
 0x2b5   :  { %v2424_v38 = vpop.f32.mrb[40].mxu1 }
 0x2b6   :  { %v3680_v14 = vpop.f32.mrb[56].mxu0  ;;  %v4086_v11 = vpop.f32.mrb[41].mxu1 }
 0x2b7   :  { %v3681_v12 = vpop.f32.mrb[57].mxu0  ;;  %v2427_v15 = vpop.f32.mrb[42].mxu1 }
 0x2b8   :  { %v3682_v16 = vadd.f32 %v3681_v12, %v3680_v14  ;;  %v3683_v17 = vpop.f32.mrb[58].mxu0  ;;  %v4087_v18 = vpop.f32.mrb[43].mxu1 }
 0x2b9   :  { %v3684_v19 = vpop.f32.mrb[59].mxu0 }
 0x2ba   :  { %v2425_v21 = vadd.f32 %v3682_v16, %v2424_v38 }
 0x2bc   :  { %v2430_v23 = vadd.f32 %v2425_v21, %v2345_v35 }
 0x2be   :  { %v3153_v44 = vadd.f32 -128.0, %v2430_v23 }
 0x2c0   :  { %v2876_v13 = vmul.f32 1.772, %v3153_v44  ;;  %v2870_v55 = vmul.f32 0.344136, %v3153_v44 }
 0x2c2   :  { %v2877_v22 = vadd.f32 %v5846_v49, %v2876_v13  ;;  %v2871_v57 = vsub.f32 %v5846_v49, %v2870_v55 }
 0x2c4   :  { %3229 = vst [vmem:[%s5862_s2 + $0xa] sm:$0x3] %v2877_v22 }
 0x2d5   :  { %v2698_v24 = vpop.f32.mrb[44].mxu1 }
 0x2d6   :  { %v3711_v26 = vpop.f32.mrb[60].mxu0  ;;  %v4106_v27 = vpop.f32.mrb[45].mxu1 }
 0x2d7   :  { %v3712_v29 = vpop.f32.mrb[61].mxu0  ;;  %v2701_v20 = vpop.f32.mrb[46].mxu1 }
 0x2d8   :  { %v3713_v30 = vadd.f32 %v3712_v29, %v3711_v26  ;;  %v3714_v5 = vpop.f32.mrb[62].mxu0  ;;  %v4107_v6 = vpop.f32.mrb[47].mxu1 }
 0x2d9   :  { %v3715_v60 = vpop.f32.mrb[63].mxu0 }
 0x2da   :  { %v2699_v62 = vadd.f32 %v3713_v30, %v2698_v24 }
 0x2f5   :  { %v2778_v63 = vpop.f32.mrb[48].mxu1 }
 0x2f6   :  { %v3742_v7 = vpop.f32.mrb[64].mxu0  ;;  %v4126_v4 = vpop.f32.mrb[49].mxu1 }
 0x2f7   :  { %v3743_v8 = vpop.f32.mrb[65].mxu0  ;;  %v2781_v46 = vpop.f32.mrb[50].mxu1 }
 0x2f8   :  { %v3744_v31 = vadd.f32 %v3743_v8, %v3742_v7  ;;  %v3745_v32 = vpop.f32.mrb[66].mxu0  ;;  %v4127_v33 = vpop.f32.mrb[51].mxu1 }
 0x2f9   :  { %v3746_v34 = vpop.f32.mrb[67].mxu0 }
 0x2fa   :  { %v2739_v36 = vadd.f32 %v3744_v31, %v2699_v62 }
 0x2fc   :  { %v2779_v39 = vadd.f32 %v2778_v63, %v2739_v36 }
 0x315   :  { %v2858_v41 = vpop.f32.mrb[52].mxu1 }
 0x316   :  { %v3773_v42 = vpop.f32.mrb[68].mxu0  ;;  %v4146_v43 = vpop.f32.mrb[53].mxu1 }
 0x317   :  { %v3774_v45 = vpop.f32.mrb[69].mxu0  ;;  %v2861_v47 = vpop.f32.mrb[54].mxu1 }
 0x318   :  { %v3775_v48 = vadd.f32 %v3774_v45, %v3773_v42  ;;  %v3776_v0 = vpop.f32.mrb[70].mxu0  ;;  %v4147_v50 = vpop.f32.mrb[55].mxu1 }
 0x319   :  { %v3777_v52 = vpop.f32.mrb[71].mxu0 }
 0x31a   :  { %v2859_v54 = vadd.f32 %v3775_v48, %v2858_v41 }
 0x31c   :  { %v2864_v56 = vadd.f32 %v2859_v54, %v2779_v39 }
 0x31e   :  { %v3226_v40 = vadd.f32 -128.0, %v2864_v56 }
 0x320   :  { %v2866_v25 = vmul.f32 1.402, %v3226_v40  ;;  %v2872_v58 = vmul.f32 0.714136, %v3226_v40 }
 0x322   :  { %v2867_v28 = vadd.f32 %v5846_v49, %v2866_v25  ;;  %v2873_v59 = vsub.f32 %v2871_v57, %v2872_v58 }
 0x324   :  { %3227 = vst [vmem:[%s5862_s2 + $0x6] sm:$0x3] %v2867_v28  ;;  %3228 = vst [vmem:[%s5862_s2 + $0x8] sm:$0x3] %v2873_v59 }

</bundles_post_ra>
